<compile_context>
chip_gen: v6e
topology: v6e:2x2x1
jax: 0.10.0
libtpu: 0.0.40
codegen_flags: <defaults>
</compile_context>

<pallas_src>
import jax
import jax.numpy as jnp
from jax import lax
from jax.experimental import pallas as pl
from jax.experimental.pallas import tpu as pltpu

# ---------------- synthetic CLIP text-encoder config (small) ----------------
VOCAB = 64        # vocab_size
CTX = 8           # context_length (seq)
D_MODEL = 32      # transformer_width
N_HEADS = 4       # transformer_heads
HEAD_DIM = D_MODEL // N_HEADS
N_LAYERS = 2      # transformer_layers
D_FF = 4 * D_MODEL
EMBED_DIM = 16    # embed_dim (text_projection output)
EPS = 1e-5        # nn.LayerNorm default eps


def _layer_norm(x, g, b):
    mu = jnp.mean(x, axis=-1, keepdims=True)
    var = jnp.mean(jnp.square(x - mu), axis=-1, keepdims=True)
    return (x - mu) * lax.rsqrt(var + EPS) * g + b


def _dot(a, b):
    return jnp.dot(a, b, preferred_element_type=jnp.float32)


def _dot_t(a, b):
    # a @ b.T as a dot_general (no explicit in-kernel transpose).
    return lax.dot_general(a, b, (((1,), (1,)), ((), ())),
                           preferred_element_type=jnp.float32)


# ---------------- the fused kernel (one grid step == one batch row) ---------
def clip_text_kernel(eot_ref,                       # SMEM (B,) int32 (scalar prefetch)
                     x_ref,                         # (1, S, D) f32   current batch row
                     ln1_g, ln1_b,                  # (L, 1, D) f32
                     w_qkv, b_qkv,                  # (L, D, 3D) bf16 / (L, 1, 3D) f32
                     w_out, b_out,                  # (L, D, D) bf16 / (L, 1, D) f32
                     ln2_g, ln2_b,                  # (L, 1, D) f32
                     w1, b1,                        # (L, D, 4D) bf16 / (L, 1, 4D) f32
                     w2, b2,                        # (L, 4D, D) bf16 / (L, 1, D) f32
                     lnf_g, lnf_b,                  # (1, D) f32
                     proj,                          # (D, E) bf16
                     out_ref):                      # (1, 1, E) f32
    b = pl.program_id(0)
    _, S, D = x_ref.shape
    scale = jnp.float32(HEAD_DIM ** -0.5)

    # Causal additive bias (S, S), reused across layers/heads.
    rows = lax.broadcasted_iota(jnp.int32, (S, S), 0)
    cols = lax.broadcasted_iota(jnp.int32, (S, S), 1)
    attn_bias = jnp.where(cols <= rows, 0.0, -1e30).astype(jnp.float32)

    x = x_ref[0]                                    # (S, D) f32

    for l in range(N_LAYERS):                       # static: weights stay VMEM-resident
        # ---- multi-head self-attention (causal) ----
        xn = _layer_norm(x, ln1_g[l], ln1_b[l])
        qkv = _dot(xn.astype(jnp.bfloat16), w_qkv[l]) + b_qkv[l]   # (S, 3D) f32, fused QKV
        heads = []
        for h in range(N_HEADS):
            q = qkv[:, h * HEAD_DIM:(h + 1) * HEAD_DIM]
            k = qkv[:, D + h * HEAD_DIM:D + (h + 1) * HEAD_DIM]
            v = qkv[:, 2 * D + h * HEAD_DIM:2 * D + (h + 1) * HEAD_DIM]
            # bf16 operands, f32 accumulation; bias added in f32 after the matmul.
            s = _dot_t(q.astype(jnp.bfloat16), k.astype(jnp.bfloat16)) * scale + attn_bias
            s = s - jnp.max(s, axis=-1, keepdims=True)
            p = jnp.exp(s)                                          # f32 softmax
            p = p * pl.reciprocal(jnp.sum(p, axis=-1, keepdims=True), approx=True)
            heads.append(_dot(p.astype(jnp.bfloat16), v.astype(jnp.bfloat16)))  # (S, HEAD_DIM)
        att = jnp.concatenate(heads, axis=-1)                       # (S, D), head order
        x = x + _dot(att.astype(jnp.bfloat16), w_out[l]) + b_out[l]  # single out-projection

        # ---- MLP with QuickGELU (f32 elementwise) ----
        xn2 = _layer_norm(x, ln2_g[l], ln2_b[l])
        h1 = _dot(xn2.astype(jnp.bfloat16), w1[l]) + b1[l]
        h1 = h1 * jax.nn.sigmoid(1.702 * h1)
        x = x + _dot(h1.astype(jnp.bfloat16), w2[l]) + b2[l]

    # ---- EOT row select (one-hot mask, no scratch / no concat) ----
    eot = eot_ref[b]
    row_ids = lax.broadcasted_iota(jnp.int32, (S, 1), 0)
    feat = jnp.sum(jnp.where(row_ids == eot, x, 0.0), axis=0, keepdims=True)   # (1, D)

    # ln_final is per-position, so gather-then-LN == LN-then-gather.
    fn = _layer_norm(feat, lnf_g[...], lnf_b[...])
    out_ref[0] = _dot(fn.astype(jnp.bfloat16), proj[...])


# ---------------- wrapper: encode_text (TextCLIP forward) -------------------
def clip_text_encode(text, params):
    # token embedding + positional embedding (glue in plain JAX)
    x = jnp.take(params["token_embedding"], text, axis=0)             # (B, S, D)
    x = (x + params["positional_embedding"][None]).astype(jnp.float32)
    # CLIP tokenizer convention: EOT token has the largest id in every row.
    eot = jnp.argmax(text, axis=-1).astype(jnp.int32)                 # (B,)

    B, S, D = x.shape
    p = params
    weights = (p["ln1_g"], p["ln1_b"],
               p["w_qkv"], p["b_qkv"], p["w_out"], p["b_out"],
               p["ln2_g"], p["ln2_b"],
               p["w1"], p["b1"], p["w2"], p["b2"],
               p["lnf_g"], p["lnf_b"], p["proj"])

    def full_spec(a):
        # whole array resident in VMEM; constant block index => DMA'd once.
        return pl.BlockSpec(a.shape, lambda b, eot_ref, _n=a.ndim: (0,) * _n)

    grid_spec = pltpu.PrefetchScalarGridSpec(
        num_scalar_prefetch=1,
        grid=(B,),
        in_specs=[pl.BlockSpec((1, S, D), lambda b, eot_ref: (b, 0, 0))]
                 + [full_spec(w) for w in weights],
        out_specs=pl.BlockSpec((1, 1, EMBED_DIM), lambda b, eot_ref: (b, 0, 0)),
    )

    out = pl.pallas_call(
        clip_text_kernel,
        out_shape=jax.ShapeDtypeStruct((B, 1, EMBED_DIM), jnp.float32),
        grid_spec=grid_spec,
        compiler_params=pltpu.CompilerParams(dimension_semantics=("parallel",)),
    )(eot, x, *weights)
    return out.reshape(B, EMBED_DIM)


# ---------------- deterministic params (PyTorch layout) + preparation -------
def init_torch_style_params(key):
    ks = jax.random.split(key, 3 + N_LAYERS)

    def nrm(k, shape, scale=0.02):
        return scale * jax.random.normal(k, shape, dtype=jnp.float32)

    params = {
        "token_embedding": nrm(ks[0], (VOCAB, D_MODEL)),
        "positional_embedding": nrm(ks[1], (CTX, D_MODEL), 0.01),
        "ln_final_g": jnp.ones((D_MODEL,), jnp.float32),
        "ln_final_b": jnp.zeros((D_MODEL,), jnp.float32),
        "text_projection": nrm(ks[2], (D_MODEL, EMBED_DIM), D_MODEL ** -0.5),
        "layers": [],
    }
    for l in range(N_LAYERS):
        lk = jax.random.split(jax.random.fold_in(key, 100 + l), 8)
        params["layers"].append(dict(
            ln_1_w=jnp.ones((D_MODEL,), jnp.float32),
            ln_1_b=jnp.zeros((D_MODEL,), jnp.float32),
            in_proj_weight=nrm(lk[0], (3 * D_MODEL, D_MODEL)),      # attn.in_proj_weight
            in_proj_bias=nrm(lk[1], (3 * D_MODEL,)),                # attn.in_proj_bias
            out_proj_weight=nrm(lk[2], (D_MODEL, D_MODEL)),         # attn.out_proj.weight
            out_proj_bias=nrm(lk[3], (D_MODEL,)),                   # attn.out_proj.bias
            ln_2_w=jnp.ones((D_MODEL,), jnp.float32),
            ln_2_b=jnp.zeros((D_MODEL,), jnp.float32),
            c_fc_weight=nrm(lk[4], (D_FF, D_MODEL)),                # mlp.c_fc.weight
            c_fc_bias=nrm(lk[5], (D_FF,)),
            c_proj_weight=nrm(lk[6], (D_MODEL, D_FF)),              # mlp.c_proj.weight
            c_proj_bias=nrm(lk[7], (D_MODEL,)),
        ))
    return params


def prepare_params(tp):
    """One-time layout plumbing in XLA: stack per-layer weights, pre-transpose to
    [in, out], keep QKV / out-proj fused & lane-dense, cast MXU operands to bf16."""
    D = D_MODEL
    keys = ("ln1_g", "ln1_b", "w_qkv", "b_qkv", "w_out", "b_out",
            "ln2_g", "ln2_b", "w1", "b1", "w2", "b2")
    stacks = {k: [] for k in keys}
    for lp in tp["layers"]:
        stacks["ln1_g"].append(lp["ln_1_w"].reshape(1, D))
        stacks["ln1_b"].append(lp["ln_1_b"].reshape(1, D))
        stacks["w_qkv"].append(lp["in_proj_weight"].T)              # (D, 3D), cols [q|k|v]
        stacks["b_qkv"].append(lp["in_proj_bias"].reshape(1, 3 * D))
        stacks["w_out"].append(lp["out_proj_weight"].T)             # (D, D)
        stacks["b_out"].append(lp["out_proj_bias"].reshape(1, D))
        stacks["ln2_g"].append(lp["ln_2_w"].reshape(1, D))
        stacks["ln2_b"].append(lp["ln_2_b"].reshape(1, D))
        stacks["w1"].append(lp["c_fc_weight"].T)                    # (D, 4D)
        stacks["b1"].append(lp["c_fc_bias"].reshape(1, D_FF))
        stacks["w2"].append(lp["c_proj_weight"].T)                  # (4D, D)
        stacks["b2"].append(lp["c_proj_bias"].reshape(1, D))

    out = {k: jnp.stack(v) for k, v in stacks.items()}
    for k in ("w_qkv", "w_out", "w1", "w2"):                        # MXU operands -> bf16
        out[k] = out[k].astype(jnp.bfloat16)
    out.update(
        token_embedding=tp["token_embedding"],
        positional_embedding=tp["positional_embedding"],
        lnf_g=tp["ln_final_g"].reshape(1, D),
        lnf_b=tp["ln_final_b"].reshape(1, D),
        proj=tp["text_projection"].astype(jnp.bfloat16),
    )
    return out


# ---------------- pure-JAX f32 reference (tolerance check) ------------------
def clip_text_encode_ref(text, tp):
    x = jnp.take(tp["token_embedding"], text, axis=0) + tp["positional_embedding"][None]
    x = x.astype(jnp.float32)
    B, S, D = x.shape
    mask = jnp.where(jnp.arange(S)[None, :] <= jnp.arange(S)[:, None], 0.0, -1e30)

    def ln(v, g, b):
        mu = v.mean(-1, keepdims=True)
        var = ((v - mu) ** 2).mean(-1, keepdims=True)
        return (v - mu) / jnp.sqrt(var + EPS) * g + b

    def split_heads(t):
        return t.reshape(B, S, N_HEADS, HEAD_DIM).transpose(0, 2, 1, 3)

    for lp in tp["layers"]:
        xn = ln(x, lp["ln_1_w"], lp["ln_1_b"])
        qkv = xn @ lp["in_proj_weight"].T + lp["in_proj_bias"]
        q, k, v = (split_heads(t) for t in jnp.split(qkv, 3, axis=-1))
        s = jnp.einsum("bhqd,bhkd->bhqk", q, k) / (HEAD_DIM ** 0.5) + mask[None, None]
        p = jax.nn.softmax(s, axis=-1)
        o = jnp.einsum("bhqk,bhkd->bhqd", p, v).transpose(0, 2, 1, 3).reshape(B, S, D)
        x = x + o @ lp["out_proj_weight"].T + lp["out_proj_bias"]
        xn2 = ln(x, lp["ln_2_w"], lp["ln_2_b"])
        h1 = xn2 @ lp["c_fc_weight"].T + lp["c_fc_bias"]
        h1 = h1 * jax.nn.sigmoid(1.702 * h1)
        x = x + h1 @ lp["c_proj_weight"].T + lp["c_proj_bias"]

    x = ln(x, tp["ln_final_g"], tp["ln_final_b"])
    eot = jnp.argmax(text, axis=-1)
    return x[jnp.arange(B), eot] @ tp["text_projection"]


if __name__ == "__main__":
    key = jax.random.PRNGKey(0)
    torch_params = init_torch_style_params(key)
    params = prepare_params(torch_params)

    B = 2
    tkey = jax.random.fold_in(key, 123)
    body = jax.random.randint(tkey, (B, CTX - 1), 0, VOCAB - 1)
    eot_tok = jnp.full((B, 1), VOCAB - 1, dtype=body.dtype)        # EOT = highest id
    text = jnp.concatenate([body, eot_tok], axis=1).astype(jnp.int32)  # (B, S)

    out = clip_text_encode(text, params)
    out = jax.block_until_ready(out)

    assert out.shape == (B, EMBED_DIM), out.shape
    assert bool(jnp.all(jnp.isfinite(out)))

    # Tolerance check vs pure-JAX f32 reference (bf16 MXU + approx reciprocal).
    ref = clip_text_encode_ref(text, torch_params)
    err = float(jnp.max(jnp.abs(out - ref)))
    assert err < 5e-2, f"max abs error {err}"

    print("KERNEL_OK")
</pallas_src>

<mosaic_0001>
module attributes {stable_mosaic.version = 11 : i64} {
  func.func @clip_text_kernel(%arg0: i32, %arg1: memref<2xi32, #tpu.memory_space<smem>>, %arg2: memref<1x8x32xf32, #tpu.memory_space<vmem>>, %arg3: memref<2x1x32xf32, #tpu.memory_space<vmem>>, %arg4: memref<2x1x32xf32, #tpu.memory_space<vmem>>, %arg5: memref<2x32x96xbf16, #tpu.memory_space<vmem>>, %arg6: memref<2x1x96xf32, #tpu.memory_space<vmem>>, %arg7: memref<2x32x32xbf16, #tpu.memory_space<vmem>>, %arg8: memref<2x1x32xf32, #tpu.memory_space<vmem>>, %arg9: memref<2x1x32xf32, #tpu.memory_space<vmem>>, %arg10: memref<2x1x32xf32, #tpu.memory_space<vmem>>, %arg11: memref<2x32x128xbf16, #tpu.memory_space<vmem>>, %arg12: memref<2x1x128xf32, #tpu.memory_space<vmem>>, %arg13: memref<2x128x32xbf16, #tpu.memory_space<vmem>>, %arg14: memref<2x1x32xf32, #tpu.memory_space<vmem>>, %arg15: memref<1x32xf32, #tpu.memory_space<vmem>>, %arg16: memref<1x32xf32, #tpu.memory_space<vmem>>, %arg17: memref<32x16xbf16, #tpu.memory_space<vmem>>, %arg18: memref<1x1x16xf32, #tpu.memory_space<vmem>>) attributes {dimension_semantics = [#tpu.dimension_semantics<parallel>], iteration_bounds = array<i64: 2>, scalar_prefetch = 1 : i64, scratch_operands = 0 : i64, tpu.core_type = #tpu.core_type<tc>, window_params = [{transform_indices = @transform_0, window_bounds = array<i64: 1, 8, 32>}, {pipeline_mode = #tpu.pipeline_mode<synchronous>, transform_indices = @transform_1, window_bounds = array<i64: 2, 1, 32>}, {pipeline_mode = #tpu.pipeline_mode<synchronous>, transform_indices = @transform_2, window_bounds = array<i64: 2, 1, 32>}, {pipeline_mode = #tpu.pipeline_mode<synchronous>, transform_indices = @transform_3, window_bounds = array<i64: 2, 32, 96>}, {pipeline_mode = #tpu.pipeline_mode<synchronous>, transform_indices = @transform_4, window_bounds = array<i64: 2, 1, 96>}, {pipeline_mode = #tpu.pipeline_mode<synchronous>, transform_indices = @transform_5, window_bounds = array<i64: 2, 32, 32>}, {pipeline_mode = #tpu.pipeline_mode<synchronous>, transform_indices = @transform_6, window_bounds = array<i64: 2, 1, 32>}, {pipeline_mode = #tpu.pipeline_mode<synchronous>, transform_indices = @transform_7, window_bounds = array<i64: 2, 1, 32>}, {pipeline_mode = #tpu.pipeline_mode<synchronous>, transform_indices = @transform_8, window_bounds = array<i64: 2, 1, 32>}, {pipeline_mode = #tpu.pipeline_mode<synchronous>, transform_indices = @transform_9, window_bounds = array<i64: 2, 32, 128>}, {pipeline_mode = #tpu.pipeline_mode<synchronous>, transform_indices = @transform_10, window_bounds = array<i64: 2, 1, 128>}, {pipeline_mode = #tpu.pipeline_mode<synchronous>, transform_indices = @transform_11, window_bounds = array<i64: 2, 128, 32>}, {pipeline_mode = #tpu.pipeline_mode<synchronous>, transform_indices = @transform_12, window_bounds = array<i64: 2, 1, 32>}, {pipeline_mode = #tpu.pipeline_mode<synchronous>, transform_indices = @transform_13, window_bounds = array<i64: 1, 32>}, {pipeline_mode = #tpu.pipeline_mode<synchronous>, transform_indices = @transform_14, window_bounds = array<i64: 1, 32>}, {pipeline_mode = #tpu.pipeline_mode<synchronous>, transform_indices = @transform_15, window_bounds = array<i64: 32, 16>}, {transform_indices = @transform_16, window_bounds = array<i64: 1, 1, 16>}]} {
    %0 = tpu.iota {dimensions = array<i32: 0>} : vector<8x8xi32>
    %1 = tpu.iota {dimensions = array<i32: 1>} : vector<8x8xi32>
    %2 = arith.cmpi sle, %1, %0 : vector<8x8xi32>
    %cst = arith.constant 0.000000e+00 : f32
    %cst_0 = arith.constant -1.000000e+30 : f32
    %3 = vector.broadcast %cst : f32 to vector<8x8xf32>
    %4 = vector.broadcast %cst_0 : f32 to vector<8x8xf32>
    %5 = arith.select %2, %3, %4 : vector<8x8xi1>, vector<8x8xf32>
    %c0 = arith.constant 0 : index
    %c0_1 = arith.constant 0 : index
    %c0_2 = arith.constant 0 : index
    %6 = vector.load %arg2[%c0, %c0_1, %c0_2] : memref<1x8x32xf32, #tpu.memory_space<vmem>>, vector<1x8x32xf32>
    %7 = vector.shape_cast %6 : vector<1x8x32xf32> to vector<8x32xf32>
    %c0_3 = arith.constant 0 : index
    %c0_4 = arith.constant 0 : index
    %c0_5 = arith.constant 0 : index
    %8 = vector.load %arg3[%c0_3, %c0_4, %c0_5] : memref<2x1x32xf32, #tpu.memory_space<vmem>>, vector<1x1x32xf32>
    %9 = vector.shape_cast %8 : vector<1x1x32xf32> to vector<1x32xf32>
    %c0_6 = arith.constant 0 : index
    %c0_7 = arith.constant 0 : index
    %c0_8 = arith.constant 0 : index
    %10 = vector.load %arg4[%c0_6, %c0_7, %c0_8] : memref<2x1x32xf32, #tpu.memory_space<vmem>>, vector<1x1x32xf32>
    %11 = vector.shape_cast %10 : vector<1x1x32xf32> to vector<1x32xf32>
    %cst_9 = arith.constant dense<0.000000e+00> : vector<8xf32>
    %12 = vector.multi_reduction <add>, %7, %cst_9 [1] : vector<8x32xf32> to vector<8xf32>
    %13 = vector.shape_cast %12 : vector<8xf32> to vector<8x1xf32>
    %cst_10 = arith.constant 3.200000e+01 : f32
    %14 = vector.broadcast %cst_10 : f32 to vector<8x1xf32>
    %15 = arith.divf %13, %14 : vector<8x1xf32>
    %16 = vector.broadcast %15 : vector<8x1xf32> to vector<8x32xf32>
    %17 = arith.subf %7, %16 : vector<8x32xf32>
    %18 = arith.mulf %17, %17 : vector<8x32xf32>
    %cst_11 = arith.constant dense<0.000000e+00> : vector<8xf32>
    %19 = vector.multi_reduction <add>, %18, %cst_11 [1] : vector<8x32xf32> to vector<8xf32>
    %20 = vector.shape_cast %19 : vector<8xf32> to vector<8x1xf32>
    %cst_12 = arith.constant 3.200000e+01 : f32
    %21 = vector.broadcast %cst_12 : f32 to vector<8x1xf32>
    %22 = arith.divf %20, %21 : vector<8x1xf32>
    %23 = vector.broadcast %15 : vector<8x1xf32> to vector<8x32xf32>
    %24 = arith.subf %7, %23 : vector<8x32xf32>
    %cst_13 = arith.constant 9.99999974E-6 : f32
    %25 = vector.broadcast %cst_13 : f32 to vector<8x1xf32>
    %26 = arith.addf %22, %25 : vector<8x1xf32>
    %27 = math.rsqrt %26 : vector<8x1xf32>
    %28 = vector.broadcast %27 : vector<8x1xf32> to vector<8x32xf32>
    %29 = arith.mulf %24, %28 : vector<8x32xf32>
    %30 = vector.broadcast %9 : vector<1x32xf32> to vector<8x32xf32>
    %31 = arith.mulf %29, %30 : vector<8x32xf32>
    %32 = vector.broadcast %11 : vector<1x32xf32> to vector<8x32xf32>
    %33 = arith.addf %31, %32 : vector<8x32xf32>
    %34 = arith.truncf %33 : vector<8x32xf32> to vector<8x32xbf16>
    %c0_14 = arith.constant 0 : index
    %c0_15 = arith.constant 0 : index
    %c0_16 = arith.constant 0 : index
    %35 = vector.load %arg5[%c0_14, %c0_15, %c0_16] : memref<2x32x96xbf16, #tpu.memory_space<vmem>>, vector<1x32x96xbf16>
    %36 = vector.shape_cast %35 : vector<1x32x96xbf16> to vector<32x96xbf16>
    %cst_17 = arith.constant dense<0.000000e+00> : vector<8x96xf32>
    %37 = tpu.matmul %34, %36, %cst_17 {dimension_numbers = #tpu.dot_dimension_numbers<[1], [0], [0], [1], [0, 0, 1, 1], [], []>} : vector<8x32xbf16>, vector<32x96xbf16>, vector<8x96xf32> -> vector<8x96xf32>
    %c0_18 = arith.constant 0 : index
    %c0_19 = arith.constant 0 : index
    %c0_20 = arith.constant 0 : index
    %38 = vector.load %arg6[%c0_18, %c0_19, %c0_20] : memref<2x1x96xf32, #tpu.memory_space<vmem>>, vector<1x1x96xf32>
    %39 = vector.shape_cast %38 : vector<1x1x96xf32> to vector<1x96xf32>
    %40 = vector.broadcast %39 : vector<1x96xf32> to vector<8x96xf32>
    %41 = arith.addf %37, %40 : vector<8x96xf32>
    %42 = vector.extract_strided_slice %41 {offsets = [0, 0], sizes = [8, 8], strides = [1, 1]} : vector<8x96xf32> to vector<8x8xf32>
    %43 = vector.extract_strided_slice %41 {offsets = [0, 32], sizes = [8, 8], strides = [1, 1]} : vector<8x96xf32> to vector<8x8xf32>
    %44 = vector.extract_strided_slice %41 {offsets = [0, 64], sizes = [8, 8], strides = [1, 1]} : vector<8x96xf32> to vector<8x8xf32>
    %45 = arith.truncf %42 : vector<8x8xf32> to vector<8x8xbf16>
    %46 = arith.truncf %43 : vector<8x8xf32> to vector<8x8xbf16>
    %cst_21 = arith.constant dense<0.000000e+00> : vector<8x8xf32>
    %47 = tpu.matmul %45, %46, %cst_21 {dimension_numbers = #tpu.dot_dimension_numbers<[1], [1], [0], [0], [0, 0, 1, 0], [], []>} : vector<8x8xbf16>, vector<8x8xbf16>, vector<8x8xf32> -> vector<8x8xf32>
    %cst_22 = arith.constant 0.353553385 : f32
    %48 = vector.broadcast %cst_22 : f32 to vector<8x8xf32>
    %49 = arith.mulf %47, %48 : vector<8x8xf32>
    %50 = arith.addf %49, %5 : vector<8x8xf32>
    %cst_23 = arith.constant dense<0xFF800000> : vector<8xf32>
    %51 = vector.multi_reduction <maximumf>, %50, %cst_23 [1] : vector<8x8xf32> to vector<8xf32>
    %52 = vector.shape_cast %51 : vector<8xf32> to vector<8x1xf32>
    %53 = vector.broadcast %52 : vector<8x1xf32> to vector<8x8xf32>
    %54 = arith.subf %50, %53 : vector<8x8xf32>
    %55 = math.exp %54 : vector<8x8xf32>
    %cst_24 = arith.constant dense<0.000000e+00> : vector<8xf32>
    %56 = vector.multi_reduction <add>, %55, %cst_24 [1] : vector<8x8xf32> to vector<8xf32>
    %57 = vector.shape_cast %56 : vector<8xf32> to vector<8x1xf32>
    %58 = tpu.reciprocal %57 {approx = true} : vector<8x1xf32> -> vector<8x1xf32>
    %59 = vector.broadcast %58 : vector<8x1xf32> to vector<8x8xf32>
    %60 = arith.mulf %55, %59 : vector<8x8xf32>
    %61 = arith.truncf %60 : vector<8x8xf32> to vector<8x8xbf16>
    %62 = arith.truncf %44 : vector<8x8xf32> to vector<8x8xbf16>
    %cst_25 = arith.constant dense<0.000000e+00> : vector<8x8xf32>
    %63 = tpu.matmul %61, %62, %cst_25 {dimension_numbers = #tpu.dot_dimension_numbers<[1], [0], [0], [1], [0, 0, 1, 1], [], []>} : vector<8x8xbf16>, vector<8x8xbf16>, vector<8x8xf32> -> vector<8x8xf32>
    %64 = vector.extract_strided_slice %41 {offsets = [0, 8], sizes = [8, 8], strides = [1, 1]} : vector<8x96xf32> to vector<8x8xf32>
    %65 = vector.extract_strided_slice %41 {offsets = [0, 40], sizes = [8, 8], strides = [1, 1]} : vector<8x96xf32> to vector<8x8xf32>
    %66 = vector.extract_strided_slice %41 {offsets = [0, 72], sizes = [8, 8], strides = [1, 1]} : vector<8x96xf32> to vector<8x8xf32>
    %67 = arith.truncf %64 : vector<8x8xf32> to vector<8x8xbf16>
    %68 = arith.truncf %65 : vector<8x8xf32> to vector<8x8xbf16>
    %cst_26 = arith.constant dense<0.000000e+00> : vector<8x8xf32>
    %69 = tpu.matmul %67, %68, %cst_26 {dimension_numbers = #tpu.dot_dimension_numbers<[1], [1], [0], [0], [0, 0, 1, 0], [], []>} : vector<8x8xbf16>, vector<8x8xbf16>, vector<8x8xf32> -> vector<8x8xf32>
    %cst_27 = arith.constant 0.353553385 : f32
    %70 = vector.broadcast %cst_27 : f32 to vector<8x8xf32>
    %71 = arith.mulf %69, %70 : vector<8x8xf32>
    %72 = arith.addf %71, %5 : vector<8x8xf32>
    %cst_28 = arith.constant dense<0xFF800000> : vector<8xf32>
    %73 = vector.multi_reduction <maximumf>, %72, %cst_28 [1] : vector<8x8xf32> to vector<8xf32>
    %74 = vector.shape_cast %73 : vector<8xf32> to vector<8x1xf32>
    %75 = vector.broadcast %74 : vector<8x1xf32> to vector<8x8xf32>
    %76 = arith.subf %72, %75 : vector<8x8xf32>
    %77 = math.exp %76 : vector<8x8xf32>
    %cst_29 = arith.constant dense<0.000000e+00> : vector<8xf32>
    %78 = vector.multi_reduction <add>, %77, %cst_29 [1] : vector<8x8xf32> to vector<8xf32>
    %79 = vector.shape_cast %78 : vector<8xf32> to vector<8x1xf32>
    %80 = tpu.reciprocal %79 {approx = true} : vector<8x1xf32> -> vector<8x1xf32>
    %81 = vector.broadcast %80 : vector<8x1xf32> to vector<8x8xf32>
    %82 = arith.mulf %77, %81 : vector<8x8xf32>
    %83 = arith.truncf %82 : vector<8x8xf32> to vector<8x8xbf16>
    %84 = arith.truncf %66 : vector<8x8xf32> to vector<8x8xbf16>
    %cst_30 = arith.constant dense<0.000000e+00> : vector<8x8xf32>
    %85 = tpu.matmul %83, %84, %cst_30 {dimension_numbers = #tpu.dot_dimension_numbers<[1], [0], [0], [1], [0, 0, 1, 1], [], []>} : vector<8x8xbf16>, vector<8x8xbf16>, vector<8x8xf32> -> vector<8x8xf32>
    %86 = vector.extract_strided_slice %41 {offsets = [0, 16], sizes = [8, 8], strides = [1, 1]} : vector<8x96xf32> to vector<8x8xf32>
    %87 = vector.extract_strided_slice %41 {offsets = [0, 48], sizes = [8, 8], strides = [1, 1]} : vector<8x96xf32> to vector<8x8xf32>
    %88 = vector.extract_strided_slice %41 {offsets = [0, 80], sizes = [8, 8], strides = [1, 1]} : vector<8x96xf32> to vector<8x8xf32>
    %89 = arith.truncf %86 : vector<8x8xf32> to vector<8x8xbf16>
    %90 = arith.truncf %87 : vector<8x8xf32> to vector<8x8xbf16>
    %cst_31 = arith.constant dense<0.000000e+00> : vector<8x8xf32>
    %91 = tpu.matmul %89, %90, %cst_31 {dimension_numbers = #tpu.dot_dimension_numbers<[1], [1], [0], [0], [0, 0, 1, 0], [], []>} : vector<8x8xbf16>, vector<8x8xbf16>, vector<8x8xf32> -> vector<8x8xf32>
    %cst_32 = arith.constant 0.353553385 : f32
    %92 = vector.broadcast %cst_32 : f32 to vector<8x8xf32>
    %93 = arith.mulf %91, %92 : vector<8x8xf32>
    %94 = arith.addf %93, %5 : vector<8x8xf32>
    %cst_33 = arith.constant dense<0xFF800000> : vector<8xf32>
    %95 = vector.multi_reduction <maximumf>, %94, %cst_33 [1] : vector<8x8xf32> to vector<8xf32>
    %96 = vector.shape_cast %95 : vector<8xf32> to vector<8x1xf32>
    %97 = vector.broadcast %96 : vector<8x1xf32> to vector<8x8xf32>
    %98 = arith.subf %94, %97 : vector<8x8xf32>
    %99 = math.exp %98 : vector<8x8xf32>
    %cst_34 = arith.constant dense<0.000000e+00> : vector<8xf32>
    %100 = vector.multi_reduction <add>, %99, %cst_34 [1] : vector<8x8xf32> to vector<8xf32>
    %101 = vector.shape_cast %100 : vector<8xf32> to vector<8x1xf32>
    %102 = tpu.reciprocal %101 {approx = true} : vector<8x1xf32> -> vector<8x1xf32>
    %103 = vector.broadcast %102 : vector<8x1xf32> to vector<8x8xf32>
    %104 = arith.mulf %99, %103 : vector<8x8xf32>
    %105 = arith.truncf %104 : vector<8x8xf32> to vector<8x8xbf16>
    %106 = arith.truncf %88 : vector<8x8xf32> to vector<8x8xbf16>
    %cst_35 = arith.constant dense<0.000000e+00> : vector<8x8xf32>
    %107 = tpu.matmul %105, %106, %cst_35 {dimension_numbers = #tpu.dot_dimension_numbers<[1], [0], [0], [1], [0, 0, 1, 1], [], []>} : vector<8x8xbf16>, vector<8x8xbf16>, vector<8x8xf32> -> vector<8x8xf32>
    %108 = vector.extract_strided_slice %41 {offsets = [0, 24], sizes = [8, 8], strides = [1, 1]} : vector<8x96xf32> to vector<8x8xf32>
    %109 = vector.extract_strided_slice %41 {offsets = [0, 56], sizes = [8, 8], strides = [1, 1]} : vector<8x96xf32> to vector<8x8xf32>
    %110 = vector.extract_strided_slice %41 {offsets = [0, 88], sizes = [8, 8], strides = [1, 1]} : vector<8x96xf32> to vector<8x8xf32>
    %111 = arith.truncf %108 : vector<8x8xf32> to vector<8x8xbf16>
    %112 = arith.truncf %109 : vector<8x8xf32> to vector<8x8xbf16>
    %cst_36 = arith.constant dense<0.000000e+00> : vector<8x8xf32>
    %113 = tpu.matmul %111, %112, %cst_36 {dimension_numbers = #tpu.dot_dimension_numbers<[1], [1], [0], [0], [0, 0, 1, 0], [], []>} : vector<8x8xbf16>, vector<8x8xbf16>, vector<8x8xf32> -> vector<8x8xf32>
    %cst_37 = arith.constant 0.353553385 : f32
    %114 = vector.broadcast %cst_37 : f32 to vector<8x8xf32>
    %115 = arith.mulf %113, %114 : vector<8x8xf32>
    %116 = arith.addf %115, %5 : vector<8x8xf32>
    %cst_38 = arith.constant dense<0xFF800000> : vector<8xf32>
    %117 = vector.multi_reduction <maximumf>, %116, %cst_38 [1] : vector<8x8xf32> to vector<8xf32>
    %118 = vector.shape_cast %117 : vector<8xf32> to vector<8x1xf32>
    %119 = vector.broadcast %118 : vector<8x1xf32> to vector<8x8xf32>
    %120 = arith.subf %116, %119 : vector<8x8xf32>
    %121 = math.exp %120 : vector<8x8xf32>
    %cst_39 = arith.constant dense<0.000000e+00> : vector<8xf32>
    %122 = vector.multi_reduction <add>, %121, %cst_39 [1] : vector<8x8xf32> to vector<8xf32>
    %123 = vector.shape_cast %122 : vector<8xf32> to vector<8x1xf32>
    %124 = tpu.reciprocal %123 {approx = true} : vector<8x1xf32> -> vector<8x1xf32>
    %125 = vector.broadcast %124 : vector<8x1xf32> to vector<8x8xf32>
    %126 = arith.mulf %121, %125 : vector<8x8xf32>
    %127 = arith.truncf %126 : vector<8x8xf32> to vector<8x8xbf16>
    %128 = arith.truncf %110 : vector<8x8xf32> to vector<8x8xbf16>
    %cst_40 = arith.constant dense<0.000000e+00> : vector<8x8xf32>
    %129 = tpu.matmul %127, %128, %cst_40 {dimension_numbers = #tpu.dot_dimension_numbers<[1], [0], [0], [1], [0, 0, 1, 1], [], []>} : vector<8x8xbf16>, vector<8x8xbf16>, vector<8x8xf32> -> vector<8x8xf32>
    %130 = tpu.concatenate %63, %85, %107, %129 in 1 : vector<8x8xf32>, vector<8x8xf32>, vector<8x8xf32>, vector<8x8xf32> -> vector<8x32xf32>
    %131 = arith.truncf %130 : vector<8x32xf32> to vector<8x32xbf16>
    %c0_41 = arith.constant 0 : index
    %c0_42 = arith.constant 0 : index
    %c0_43 = arith.constant 0 : index
    %132 = vector.load %arg7[%c0_41, %c0_42, %c0_43] : memref<2x32x32xbf16, #tpu.memory_space<vmem>>, vector<1x32x32xbf16>
    %133 = vector.shape_cast %132 : vector<1x32x32xbf16> to vector<32x32xbf16>
    %cst_44 = arith.constant dense<0.000000e+00> : vector<8x32xf32>
    %134 = tpu.matmul %131, %133, %cst_44 {dimension_numbers = #tpu.dot_dimension_numbers<[1], [0], [0], [1], [0, 0, 1, 1], [], []>} : vector<8x32xbf16>, vector<32x32xbf16>, vector<8x32xf32> -> vector<8x32xf32>
    %135 = arith.addf %7, %134 : vector<8x32xf32>
    %c0_45 = arith.constant 0 : index
    %c0_46 = arith.constant 0 : index
    %c0_47 = arith.constant 0 : index
    %136 = vector.load %arg8[%c0_45, %c0_46, %c0_47] : memref<2x1x32xf32, #tpu.memory_space<vmem>>, vector<1x1x32xf32>
    %137 = vector.shape_cast %136 : vector<1x1x32xf32> to vector<1x32xf32>
    %138 = vector.broadcast %137 : vector<1x32xf32> to vector<8x32xf32>
    %139 = arith.addf %135, %138 : vector<8x32xf32>
    %c0_48 = arith.constant 0 : index
    %c0_49 = arith.constant 0 : index
    %c0_50 = arith.constant 0 : index
    %140 = vector.load %arg9[%c0_48, %c0_49, %c0_50] : memref<2x1x32xf32, #tpu.memory_space<vmem>>, vector<1x1x32xf32>
    %141 = vector.shape_cast %140 : vector<1x1x32xf32> to vector<1x32xf32>
    %c0_51 = arith.constant 0 : index
    %c0_52 = arith.constant 0 : index
    %c0_53 = arith.constant 0 : index
    %142 = vector.load %arg10[%c0_51, %c0_52, %c0_53] : memref<2x1x32xf32, #tpu.memory_space<vmem>>, vector<1x1x32xf32>
    %143 = vector.shape_cast %142 : vector<1x1x32xf32> to vector<1x32xf32>
    %cst_54 = arith.constant dense<0.000000e+00> : vector<8xf32>
    %144 = vector.multi_reduction <add>, %139, %cst_54 [1] : vector<8x32xf32> to vector<8xf32>
    %145 = vector.shape_cast %144 : vector<8xf32> to vector<8x1xf32>
    %cst_55 = arith.constant 3.200000e+01 : f32
    %146 = vector.broadcast %cst_55 : f32 to vector<8x1xf32>
    %147 = arith.divf %145, %146 : vector<8x1xf32>
    %148 = vector.broadcast %147 : vector<8x1xf32> to vector<8x32xf32>
    %149 = arith.subf %139, %148 : vector<8x32xf32>
    %150 = arith.mulf %149, %149 : vector<8x32xf32>
    %cst_56 = arith.constant dense<0.000000e+00> : vector<8xf32>
    %151 = vector.multi_reduction <add>, %150, %cst_56 [1] : vector<8x32xf32> to vector<8xf32>
    %152 = vector.shape_cast %151 : vector<8xf32> to vector<8x1xf32>
    %cst_57 = arith.constant 3.200000e+01 : f32
    %153 = vector.broadcast %cst_57 : f32 to vector<8x1xf32>
    %154 = arith.divf %152, %153 : vector<8x1xf32>
    %155 = vector.broadcast %147 : vector<8x1xf32> to vector<8x32xf32>
    %156 = arith.subf %139, %155 : vector<8x32xf32>
    %cst_58 = arith.constant 9.99999974E-6 : f32
    %157 = vector.broadcast %cst_58 : f32 to vector<8x1xf32>
    %158 = arith.addf %154, %157 : vector<8x1xf32>
    %159 = math.rsqrt %158 : vector<8x1xf32>
    %160 = vector.broadcast %159 : vector<8x1xf32> to vector<8x32xf32>
    %161 = arith.mulf %156, %160 : vector<8x32xf32>
    %162 = vector.broadcast %141 : vector<1x32xf32> to vector<8x32xf32>
    %163 = arith.mulf %161, %162 : vector<8x32xf32>
    %164 = vector.broadcast %143 : vector<1x32xf32> to vector<8x32xf32>
    %165 = arith.addf %163, %164 : vector<8x32xf32>
    %166 = arith.truncf %165 : vector<8x32xf32> to vector<8x32xbf16>
    %c0_59 = arith.constant 0 : index
    %c0_60 = arith.constant 0 : index
    %c0_61 = arith.constant 0 : index
    %167 = vector.load %arg11[%c0_59, %c0_60, %c0_61] : memref<2x32x128xbf16, #tpu.memory_space<vmem>>, vector<1x32x128xbf16>
    %168 = vector.shape_cast %167 : vector<1x32x128xbf16> to vector<32x128xbf16>
    %cst_62 = arith.constant dense<0.000000e+00> : vector<8x128xf32>
    %169 = tpu.matmul %166, %168, %cst_62 {dimension_numbers = #tpu.dot_dimension_numbers<[1], [0], [0], [1], [0, 0, 1, 1], [], []>} : vector<8x32xbf16>, vector<32x128xbf16>, vector<8x128xf32> -> vector<8x128xf32>
    %c0_63 = arith.constant 0 : index
    %c0_64 = arith.constant 0 : index
    %c0_65 = arith.constant 0 : index
    %170 = vector.load %arg12[%c0_63, %c0_64, %c0_65] : memref<2x1x128xf32, #tpu.memory_space<vmem>>, vector<1x1x128xf32>
    %171 = vector.shape_cast %170 : vector<1x1x128xf32> to vector<1x128xf32>
    %172 = vector.broadcast %171 : vector<1x128xf32> to vector<8x128xf32>
    %173 = arith.addf %169, %172 : vector<8x128xf32>
    %cst_66 = arith.constant 1.702000e+00 : f32
    %174 = vector.broadcast %cst_66 : f32 to vector<8x128xf32>
    %175 = arith.mulf %174, %173 : vector<8x128xf32>
    %176 = arith.negf %175 : vector<8x128xf32>
    %177 = math.exp %176 : vector<8x128xf32>
    %cst_67 = arith.constant 1.000000e+00 : f32
    %178 = vector.broadcast %cst_67 : f32 to vector<8x128xf32>
    %179 = arith.addf %178, %177 : vector<8x128xf32>
    %180 = arith.divf %178, %179 : vector<8x128xf32>
    %181 = arith.mulf %173, %180 : vector<8x128xf32>
    %182 = arith.truncf %181 : vector<8x128xf32> to vector<8x128xbf16>
    %c0_68 = arith.constant 0 : index
    %c0_69 = arith.constant 0 : index
    %c0_70 = arith.constant 0 : index
    %183 = vector.load %arg13[%c0_68, %c0_69, %c0_70] : memref<2x128x32xbf16, #tpu.memory_space<vmem>>, vector<1x128x32xbf16>
    %184 = vector.shape_cast %183 : vector<1x128x32xbf16> to vector<128x32xbf16>
    %cst_71 = arith.constant dense<0.000000e+00> : vector<8x32xf32>
    %185 = tpu.matmul %182, %184, %cst_71 {dimension_numbers = #tpu.dot_dimension_numbers<[1], [0], [0], [1], [0, 0, 1, 1], [], []>} : vector<8x128xbf16>, vector<128x32xbf16>, vector<8x32xf32> -> vector<8x32xf32>
    %186 = arith.addf %139, %185 : vector<8x32xf32>
    %c0_72 = arith.constant 0 : index
    %c0_73 = arith.constant 0 : index
    %c0_74 = arith.constant 0 : index
    %187 = vector.load %arg14[%c0_72, %c0_73, %c0_74] : memref<2x1x32xf32, #tpu.memory_space<vmem>>, vector<1x1x32xf32>
    %188 = vector.shape_cast %187 : vector<1x1x32xf32> to vector<1x32xf32>
    %189 = vector.broadcast %188 : vector<1x32xf32> to vector<8x32xf32>
    %190 = arith.addf %186, %189 : vector<8x32xf32>
    %c1 = arith.constant 1 : index
    %c0_75 = arith.constant 0 : index
    %c0_76 = arith.constant 0 : index
    %191 = vector.load %arg3[%c1, %c0_75, %c0_76] : memref<2x1x32xf32, #tpu.memory_space<vmem>>, vector<1x1x32xf32>
    %192 = vector.shape_cast %191 : vector<1x1x32xf32> to vector<1x32xf32>
    %c1_77 = arith.constant 1 : index
    %c0_78 = arith.constant 0 : index
    %c0_79 = arith.constant 0 : index
    %193 = vector.load %arg4[%c1_77, %c0_78, %c0_79] : memref<2x1x32xf32, #tpu.memory_space<vmem>>, vector<1x1x32xf32>
    %194 = vector.shape_cast %193 : vector<1x1x32xf32> to vector<1x32xf32>
    %cst_80 = arith.constant dense<0.000000e+00> : vector<8xf32>
    %195 = vector.multi_reduction <add>, %190, %cst_80 [1] : vector<8x32xf32> to vector<8xf32>
    %196 = vector.shape_cast %195 : vector<8xf32> to vector<8x1xf32>
    %cst_81 = arith.constant 3.200000e+01 : f32
    %197 = vector.broadcast %cst_81 : f32 to vector<8x1xf32>
    %198 = arith.divf %196, %197 : vector<8x1xf32>
    %199 = vector.broadcast %198 : vector<8x1xf32> to vector<8x32xf32>
    %200 = arith.subf %190, %199 : vector<8x32xf32>
    %201 = arith.mulf %200, %200 : vector<8x32xf32>
    %cst_82 = arith.constant dense<0.000000e+00> : vector<8xf32>
    %202 = vector.multi_reduction <add>, %201, %cst_82 [1] : vector<8x32xf32> to vector<8xf32>
    %203 = vector.shape_cast %202 : vector<8xf32> to vector<8x1xf32>
    %cst_83 = arith.constant 3.200000e+01 : f32
    %204 = vector.broadcast %cst_83 : f32 to vector<8x1xf32>
    %205 = arith.divf %203, %204 : vector<8x1xf32>
    %206 = vector.broadcast %198 : vector<8x1xf32> to vector<8x32xf32>
    %207 = arith.subf %190, %206 : vector<8x32xf32>
    %cst_84 = arith.constant 9.99999974E-6 : f32
    %208 = vector.broadcast %cst_84 : f32 to vector<8x1xf32>
    %209 = arith.addf %205, %208 : vector<8x1xf32>
    %210 = math.rsqrt %209 : vector<8x1xf32>
    %211 = vector.broadcast %210 : vector<8x1xf32> to vector<8x32xf32>
    %212 = arith.mulf %207, %211 : vector<8x32xf32>
    %213 = vector.broadcast %192 : vector<1x32xf32> to vector<8x32xf32>
    %214 = arith.mulf %212, %213 : vector<8x32xf32>
    %215 = vector.broadcast %194 : vector<1x32xf32> to vector<8x32xf32>
    %216 = arith.addf %214, %215 : vector<8x32xf32>
    %217 = arith.truncf %216 : vector<8x32xf32> to vector<8x32xbf16>
    %c1_85 = arith.constant 1 : index
    %c0_86 = arith.constant 0 : index
    %c0_87 = arith.constant 0 : index
    %218 = vector.load %arg5[%c1_85, %c0_86, %c0_87] : memref<2x32x96xbf16, #tpu.memory_space<vmem>>, vector<1x32x96xbf16>
    %219 = vector.shape_cast %218 : vector<1x32x96xbf16> to vector<32x96xbf16>
    %cst_88 = arith.constant dense<0.000000e+00> : vector<8x96xf32>
    %220 = tpu.matmul %217, %219, %cst_88 {dimension_numbers = #tpu.dot_dimension_numbers<[1], [0], [0], [1], [0, 0, 1, 1], [], []>} : vector<8x32xbf16>, vector<32x96xbf16>, vector<8x96xf32> -> vector<8x96xf32>
    %c1_89 = arith.constant 1 : index
    %c0_90 = arith.constant 0 : index
    %c0_91 = arith.constant 0 : index
    %221 = vector.load %arg6[%c1_89, %c0_90, %c0_91] : memref<2x1x96xf32, #tpu.memory_space<vmem>>, vector<1x1x96xf32>
    %222 = vector.shape_cast %221 : vector<1x1x96xf32> to vector<1x96xf32>
    %223 = vector.broadcast %222 : vector<1x96xf32> to vector<8x96xf32>
    %224 = arith.addf %220, %223 : vector<8x96xf32>
    %225 = vector.extract_strided_slice %224 {offsets = [0, 0], sizes = [8, 8], strides = [1, 1]} : vector<8x96xf32> to vector<8x8xf32>
    %226 = vector.extract_strided_slice %224 {offsets = [0, 32], sizes = [8, 8], strides = [1, 1]} : vector<8x96xf32> to vector<8x8xf32>
    %227 = vector.extract_strided_slice %224 {offsets = [0, 64], sizes = [8, 8], strides = [1, 1]} : vector<8x96xf32> to vector<8x8xf32>
    %228 = arith.truncf %225 : vector<8x8xf32> to vector<8x8xbf16>
    %229 = arith.truncf %226 : vector<8x8xf32> to vector<8x8xbf16>
    %cst_92 = arith.constant dense<0.000000e+00> : vector<8x8xf32>
    %230 = tpu.matmul %228, %229, %cst_92 {dimension_numbers = #tpu.dot_dimension_numbers<[1], [1], [0], [0], [0, 0, 1, 0], [], []>} : vector<8x8xbf16>, vector<8x8xbf16>, vector<8x8xf32> -> vector<8x8xf32>
    %cst_93 = arith.constant 0.353553385 : f32
    %231 = vector.broadcast %cst_93 : f32 to vector<8x8xf32>
    %232 = arith.mulf %230, %231 : vector<8x8xf32>
    %233 = arith.addf %232, %5 : vector<8x8xf32>
    %cst_94 = arith.constant dense<0xFF800000> : vector<8xf32>
    %234 = vector.multi_reduction <maximumf>, %233, %cst_94 [1] : vector<8x8xf32> to vector<8xf32>
    %235 = vector.shape_cast %234 : vector<8xf32> to vector<8x1xf32>
    %236 = vector.broadcast %235 : vector<8x1xf32> to vector<8x8xf32>
    %237 = arith.subf %233, %236 : vector<8x8xf32>
    %238 = math.exp %237 : vector<8x8xf32>
    %cst_95 = arith.constant dense<0.000000e+00> : vector<8xf32>
    %239 = vector.multi_reduction <add>, %238, %cst_95 [1] : vector<8x8xf32> to vector<8xf32>
    %240 = vector.shape_cast %239 : vector<8xf32> to vector<8x1xf32>
    %241 = tpu.reciprocal %240 {approx = true} : vector<8x1xf32> -> vector<8x1xf32>
    %242 = vector.broadcast %241 : vector<8x1xf32> to vector<8x8xf32>
    %243 = arith.mulf %238, %242 : vector<8x8xf32>
    %244 = arith.truncf %243 : vector<8x8xf32> to vector<8x8xbf16>
    %245 = arith.truncf %227 : vector<8x8xf32> to vector<8x8xbf16>
    %cst_96 = arith.constant dense<0.000000e+00> : vector<8x8xf32>
    %246 = tpu.matmul %244, %245, %cst_96 {dimension_numbers = #tpu.dot_dimension_numbers<[1], [0], [0], [1], [0, 0, 1, 1], [], []>} : vector<8x8xbf16>, vector<8x8xbf16>, vector<8x8xf32> -> vector<8x8xf32>
    %247 = vector.extract_strided_slice %224 {offsets = [0, 8], sizes = [8, 8], strides = [1, 1]} : vector<8x96xf32> to vector<8x8xf32>
    %248 = vector.extract_strided_slice %224 {offsets = [0, 40], sizes = [8, 8], strides = [1, 1]} : vector<8x96xf32> to vector<8x8xf32>
    %249 = vector.extract_strided_slice %224 {offsets = [0, 72], sizes = [8, 8], strides = [1, 1]} : vector<8x96xf32> to vector<8x8xf32>
    %250 = arith.truncf %247 : vector<8x8xf32> to vector<8x8xbf16>
    %251 = arith.truncf %248 : vector<8x8xf32> to vector<8x8xbf16>
    %cst_97 = arith.constant dense<0.000000e+00> : vector<8x8xf32>
    %252 = tpu.matmul %250, %251, %cst_97 {dimension_numbers = #tpu.dot_dimension_numbers<[1], [1], [0], [0], [0, 0, 1, 0], [], []>} : vector<8x8xbf16>, vector<8x8xbf16>, vector<8x8xf32> -> vector<8x8xf32>
    %cst_98 = arith.constant 0.353553385 : f32
    %253 = vector.broadcast %cst_98 : f32 to vector<8x8xf32>
    %254 = arith.mulf %252, %253 : vector<8x8xf32>
    %255 = arith.addf %254, %5 : vector<8x8xf32>
    %cst_99 = arith.constant dense<0xFF800000> : vector<8xf32>
    %256 = vector.multi_reduction <maximumf>, %255, %cst_99 [1] : vector<8x8xf32> to vector<8xf32>
    %257 = vector.shape_cast %256 : vector<8xf32> to vector<8x1xf32>
    %258 = vector.broadcast %257 : vector<8x1xf32> to vector<8x8xf32>
    %259 = arith.subf %255, %258 : vector<8x8xf32>
    %260 = math.exp %259 : vector<8x8xf32>
    %cst_100 = arith.constant dense<0.000000e+00> : vector<8xf32>
    %261 = vector.multi_reduction <add>, %260, %cst_100 [1] : vector<8x8xf32> to vector<8xf32>
    %262 = vector.shape_cast %261 : vector<8xf32> to vector<8x1xf32>
    %263 = tpu.reciprocal %262 {approx = true} : vector<8x1xf32> -> vector<8x1xf32>
    %264 = vector.broadcast %263 : vector<8x1xf32> to vector<8x8xf32>
    %265 = arith.mulf %260, %264 : vector<8x8xf32>
    %266 = arith.truncf %265 : vector<8x8xf32> to vector<8x8xbf16>
    %267 = arith.truncf %249 : vector<8x8xf32> to vector<8x8xbf16>
    %cst_101 = arith.constant dense<0.000000e+00> : vector<8x8xf32>
    %268 = tpu.matmul %266, %267, %cst_101 {dimension_numbers = #tpu.dot_dimension_numbers<[1], [0], [0], [1], [0, 0, 1, 1], [], []>} : vector<8x8xbf16>, vector<8x8xbf16>, vector<8x8xf32> -> vector<8x8xf32>
    %269 = vector.extract_strided_slice %224 {offsets = [0, 16], sizes = [8, 8], strides = [1, 1]} : vector<8x96xf32> to vector<8x8xf32>
    %270 = vector.extract_strided_slice %224 {offsets = [0, 48], sizes = [8, 8], strides = [1, 1]} : vector<8x96xf32> to vector<8x8xf32>
    %271 = vector.extract_strided_slice %224 {offsets = [0, 80], sizes = [8, 8], strides = [1, 1]} : vector<8x96xf32> to vector<8x8xf32>
    %272 = arith.truncf %269 : vector<8x8xf32> to vector<8x8xbf16>
    %273 = arith.truncf %270 : vector<8x8xf32> to vector<8x8xbf16>
    %cst_102 = arith.constant dense<0.000000e+00> : vector<8x8xf32>
    %274 = tpu.matmul %272, %273, %cst_102 {dimension_numbers = #tpu.dot_dimension_numbers<[1], [1], [0], [0], [0, 0, 1, 0], [], []>} : vector<8x8xbf16>, vector<8x8xbf16>, vector<8x8xf32> -> vector<8x8xf32>
    %cst_103 = arith.constant 0.353553385 : f32
    %275 = vector.broadcast %cst_103 : f32 to vector<8x8xf32>
    %276 = arith.mulf %274, %275 : vector<8x8xf32>
    %277 = arith.addf %276, %5 : vector<8x8xf32>
    %cst_104 = arith.constant dense<0xFF800000> : vector<8xf32>
    %278 = vector.multi_reduction <maximumf>, %277, %cst_104 [1] : vector<8x8xf32> to vector<8xf32>
    %279 = vector.shape_cast %278 : vector<8xf32> to vector<8x1xf32>
    %280 = vector.broadcast %279 : vector<8x1xf32> to vector<8x8xf32>
    %281 = arith.subf %277, %280 : vector<8x8xf32>
    %282 = math.exp %281 : vector<8x8xf32>
    %cst_105 = arith.constant dense<0.000000e+00> : vector<8xf32>
    %283 = vector.multi_reduction <add>, %282, %cst_105 [1] : vector<8x8xf32> to vector<8xf32>
    %284 = vector.shape_cast %283 : vector<8xf32> to vector<8x1xf32>
    %285 = tpu.reciprocal %284 {approx = true} : vector<8x1xf32> -> vector<8x1xf32>
    %286 = vector.broadcast %285 : vector<8x1xf32> to vector<8x8xf32>
    %287 = arith.mulf %282, %286 : vector<8x8xf32>
    %288 = arith.truncf %287 : vector<8x8xf32> to vector<8x8xbf16>
    %289 = arith.truncf %271 : vector<8x8xf32> to vector<8x8xbf16>
    %cst_106 = arith.constant dense<0.000000e+00> : vector<8x8xf32>
    %290 = tpu.matmul %288, %289, %cst_106 {dimension_numbers = #tpu.dot_dimension_numbers<[1], [0], [0], [1], [0, 0, 1, 1], [], []>} : vector<8x8xbf16>, vector<8x8xbf16>, vector<8x8xf32> -> vector<8x8xf32>
    %291 = vector.extract_strided_slice %224 {offsets = [0, 24], sizes = [8, 8], strides = [1, 1]} : vector<8x96xf32> to vector<8x8xf32>
    %292 = vector.extract_strided_slice %224 {offsets = [0, 56], sizes = [8, 8], strides = [1, 1]} : vector<8x96xf32> to vector<8x8xf32>
    %293 = vector.extract_strided_slice %224 {offsets = [0, 88], sizes = [8, 8], strides = [1, 1]} : vector<8x96xf32> to vector<8x8xf32>
    %294 = arith.truncf %291 : vector<8x8xf32> to vector<8x8xbf16>
    %295 = arith.truncf %292 : vector<8x8xf32> to vector<8x8xbf16>
    %cst_107 = arith.constant dense<0.000000e+00> : vector<8x8xf32>
    %296 = tpu.matmul %294, %295, %cst_107 {dimension_numbers = #tpu.dot_dimension_numbers<[1], [1], [0], [0], [0, 0, 1, 0], [], []>} : vector<8x8xbf16>, vector<8x8xbf16>, vector<8x8xf32> -> vector<8x8xf32>
    %cst_108 = arith.constant 0.353553385 : f32
    %297 = vector.broadcast %cst_108 : f32 to vector<8x8xf32>
    %298 = arith.mulf %296, %297 : vector<8x8xf32>
    %299 = arith.addf %298, %5 : vector<8x8xf32>
    %cst_109 = arith.constant dense<0xFF800000> : vector<8xf32>
    %300 = vector.multi_reduction <maximumf>, %299, %cst_109 [1] : vector<8x8xf32> to vector<8xf32>
    %301 = vector.shape_cast %300 : vector<8xf32> to vector<8x1xf32>
    %302 = vector.broadcast %301 : vector<8x1xf32> to vector<8x8xf32>
    %303 = arith.subf %299, %302 : vector<8x8xf32>
    %304 = math.exp %303 : vector<8x8xf32>
    %cst_110 = arith.constant dense<0.000000e+00> : vector<8xf32>
    %305 = vector.multi_reduction <add>, %304, %cst_110 [1] : vector<8x8xf32> to vector<8xf32>
    %306 = vector.shape_cast %305 : vector<8xf32> to vector<8x1xf32>
    %307 = tpu.reciprocal %306 {approx = true} : vector<8x1xf32> -> vector<8x1xf32>
    %308 = vector.broadcast %307 : vector<8x1xf32> to vector<8x8xf32>
    %309 = arith.mulf %304, %308 : vector<8x8xf32>
    %310 = arith.truncf %309 : vector<8x8xf32> to vector<8x8xbf16>
    %311 = arith.truncf %293 : vector<8x8xf32> to vector<8x8xbf16>
    %cst_111 = arith.constant dense<0.000000e+00> : vector<8x8xf32>
    %312 = tpu.matmul %310, %311, %cst_111 {dimension_numbers = #tpu.dot_dimension_numbers<[1], [0], [0], [1], [0, 0, 1, 1], [], []>} : vector<8x8xbf16>, vector<8x8xbf16>, vector<8x8xf32> -> vector<8x8xf32>
    %313 = tpu.concatenate %246, %268, %290, %312 in 1 : vector<8x8xf32>, vector<8x8xf32>, vector<8x8xf32>, vector<8x8xf32> -> vector<8x32xf32>
    %314 = arith.truncf %313 : vector<8x32xf32> to vector<8x32xbf16>
    %c1_112 = arith.constant 1 : index
    %c0_113 = arith.constant 0 : index
    %c0_114 = arith.constant 0 : index
    %315 = vector.load %arg7[%c1_112, %c0_113, %c0_114] : memref<2x32x32xbf16, #tpu.memory_space<vmem>>, vector<1x32x32xbf16>
    %316 = vector.shape_cast %315 : vector<1x32x32xbf16> to vector<32x32xbf16>
    %cst_115 = arith.constant dense<0.000000e+00> : vector<8x32xf32>
    %317 = tpu.matmul %314, %316, %cst_115 {dimension_numbers = #tpu.dot_dimension_numbers<[1], [0], [0], [1], [0, 0, 1, 1], [], []>} : vector<8x32xbf16>, vector<32x32xbf16>, vector<8x32xf32> -> vector<8x32xf32>
    %318 = arith.addf %190, %317 : vector<8x32xf32>
    %c1_116 = arith.constant 1 : index
    %c0_117 = arith.constant 0 : index
    %c0_118 = arith.constant 0 : index
    %319 = vector.load %arg8[%c1_116, %c0_117, %c0_118] : memref<2x1x32xf32, #tpu.memory_space<vmem>>, vector<1x1x32xf32>
    %320 = vector.shape_cast %319 : vector<1x1x32xf32> to vector<1x32xf32>
    %321 = vector.broadcast %320 : vector<1x32xf32> to vector<8x32xf32>
    %322 = arith.addf %318, %321 : vector<8x32xf32>
    %c1_119 = arith.constant 1 : index
    %c0_120 = arith.constant 0 : index
    %c0_121 = arith.constant 0 : index
    %323 = vector.load %arg9[%c1_119, %c0_120, %c0_121] : memref<2x1x32xf32, #tpu.memory_space<vmem>>, vector<1x1x32xf32>
    %324 = vector.shape_cast %323 : vector<1x1x32xf32> to vector<1x32xf32>
    %c1_122 = arith.constant 1 : index
    %c0_123 = arith.constant 0 : index
    %c0_124 = arith.constant 0 : index
    %325 = vector.load %arg10[%c1_122, %c0_123, %c0_124] : memref<2x1x32xf32, #tpu.memory_space<vmem>>, vector<1x1x32xf32>
    %326 = vector.shape_cast %325 : vector<1x1x32xf32> to vector<1x32xf32>
    %cst_125 = arith.constant dense<0.000000e+00> : vector<8xf32>
    %327 = vector.multi_reduction <add>, %322, %cst_125 [1] : vector<8x32xf32> to vector<8xf32>
    %328 = vector.shape_cast %327 : vector<8xf32> to vector<8x1xf32>
    %cst_126 = arith.constant 3.200000e+01 : f32
    %329 = vector.broadcast %cst_126 : f32 to vector<8x1xf32>
    %330 = arith.divf %328, %329 : vector<8x1xf32>
    %331 = vector.broadcast %330 : vector<8x1xf32> to vector<8x32xf32>
    %332 = arith.subf %322, %331 : vector<8x32xf32>
    %333 = arith.mulf %332, %332 : vector<8x32xf32>
    %cst_127 = arith.constant dense<0.000000e+00> : vector<8xf32>
    %334 = vector.multi_reduction <add>, %333, %cst_127 [1] : vector<8x32xf32> to vector<8xf32>
    %335 = vector.shape_cast %334 : vector<8xf32> to vector<8x1xf32>
    %cst_128 = arith.constant 3.200000e+01 : f32
    %336 = vector.broadcast %cst_128 : f32 to vector<8x1xf32>
    %337 = arith.divf %335, %336 : vector<8x1xf32>
    %338 = vector.broadcast %330 : vector<8x1xf32> to vector<8x32xf32>
    %339 = arith.subf %322, %338 : vector<8x32xf32>
    %cst_129 = arith.constant 9.99999974E-6 : f32
    %340 = vector.broadcast %cst_129 : f32 to vector<8x1xf32>
    %341 = arith.addf %337, %340 : vector<8x1xf32>
    %342 = math.rsqrt %341 : vector<8x1xf32>
    %343 = vector.broadcast %342 : vector<8x1xf32> to vector<8x32xf32>
    %344 = arith.mulf %339, %343 : vector<8x32xf32>
    %345 = vector.broadcast %324 : vector<1x32xf32> to vector<8x32xf32>
    %346 = arith.mulf %344, %345 : vector<8x32xf32>
    %347 = vector.broadcast %326 : vector<1x32xf32> to vector<8x32xf32>
    %348 = arith.addf %346, %347 : vector<8x32xf32>
    %349 = arith.truncf %348 : vector<8x32xf32> to vector<8x32xbf16>
    %c1_130 = arith.constant 1 : index
    %c0_131 = arith.constant 0 : index
    %c0_132 = arith.constant 0 : index
    %350 = vector.load %arg11[%c1_130, %c0_131, %c0_132] : memref<2x32x128xbf16, #tpu.memory_space<vmem>>, vector<1x32x128xbf16>
    %351 = vector.shape_cast %350 : vector<1x32x128xbf16> to vector<32x128xbf16>
    %cst_133 = arith.constant dense<0.000000e+00> : vector<8x128xf32>
    %352 = tpu.matmul %349, %351, %cst_133 {dimension_numbers = #tpu.dot_dimension_numbers<[1], [0], [0], [1], [0, 0, 1, 1], [], []>} : vector<8x32xbf16>, vector<32x128xbf16>, vector<8x128xf32> -> vector<8x128xf32>
    %c1_134 = arith.constant 1 : index
    %c0_135 = arith.constant 0 : index
    %c0_136 = arith.constant 0 : index
    %353 = vector.load %arg12[%c1_134, %c0_135, %c0_136] : memref<2x1x128xf32, #tpu.memory_space<vmem>>, vector<1x1x128xf32>
    %354 = vector.shape_cast %353 : vector<1x1x128xf32> to vector<1x128xf32>
    %355 = vector.broadcast %354 : vector<1x128xf32> to vector<8x128xf32>
    %356 = arith.addf %352, %355 : vector<8x128xf32>
    %cst_137 = arith.constant 1.702000e+00 : f32
    %357 = vector.broadcast %cst_137 : f32 to vector<8x128xf32>
    %358 = arith.mulf %357, %356 : vector<8x128xf32>
    %359 = arith.negf %358 : vector<8x128xf32>
    %360 = math.exp %359 : vector<8x128xf32>
    %cst_138 = arith.constant 1.000000e+00 : f32
    %361 = vector.broadcast %cst_138 : f32 to vector<8x128xf32>
    %362 = arith.addf %361, %360 : vector<8x128xf32>
    %363 = arith.divf %361, %362 : vector<8x128xf32>
    %364 = arith.mulf %356, %363 : vector<8x128xf32>
    %365 = arith.truncf %364 : vector<8x128xf32> to vector<8x128xbf16>
    %c1_139 = arith.constant 1 : index
    %c0_140 = arith.constant 0 : index
    %c0_141 = arith.constant 0 : index
    %366 = vector.load %arg13[%c1_139, %c0_140, %c0_141] : memref<2x128x32xbf16, #tpu.memory_space<vmem>>, vector<1x128x32xbf16>
    %367 = vector.shape_cast %366 : vector<1x128x32xbf16> to vector<128x32xbf16>
    %cst_142 = arith.constant dense<0.000000e+00> : vector<8x32xf32>
    %368 = tpu.matmul %365, %367, %cst_142 {dimension_numbers = #tpu.dot_dimension_numbers<[1], [0], [0], [1], [0, 0, 1, 1], [], []>} : vector<8x128xbf16>, vector<128x32xbf16>, vector<8x32xf32> -> vector<8x32xf32>
    %369 = arith.addf %322, %368 : vector<8x32xf32>
    %c1_143 = arith.constant 1 : index
    %c0_144 = arith.constant 0 : index
    %c0_145 = arith.constant 0 : index
    %370 = vector.load %arg14[%c1_143, %c0_144, %c0_145] : memref<2x1x32xf32, #tpu.memory_space<vmem>>, vector<1x1x32xf32>
    %371 = vector.shape_cast %370 : vector<1x1x32xf32> to vector<1x32xf32>
    %372 = vector.broadcast %371 : vector<1x32xf32> to vector<8x32xf32>
    %373 = arith.addf %369, %372 : vector<8x32xf32>
    %374 = arith.index_cast %arg0 : i32 to index
    %375 = memref.load %arg1[%374] : memref<2xi32, #tpu.memory_space<smem>>
    %376 = tpu.iota {dimensions = array<i32: 0>} : vector<8x1xi32>
    %377 = vector.broadcast %375 : i32 to vector<8x1xi32>
    %378 = arith.cmpi eq, %376, %377 : vector<8x1xi32>
    %cst_146 = arith.constant 0.000000e+00 : f32
    %379 = vector.shape_cast %378 : vector<8x1xi1> to vector<8x1xi1>
    %380 = vector.broadcast %379 : vector<8x1xi1> to vector<8x32xi1>
    %381 = vector.broadcast %cst_146 : f32 to vector<8x32xf32>
    %382 = arith.select %380, %373, %381 : vector<8x32xi1>, vector<8x32xf32>
    %cst_147 = arith.constant dense<0.000000e+00> : vector<32xf32>
    %383 = vector.multi_reduction <add>, %382, %cst_147 [0] : vector<8x32xf32> to vector<32xf32>
    %384 = vector.shape_cast %383 : vector<32xf32> to vector<1x32xf32>
    %c0_148 = arith.constant 0 : index
    %c0_149 = arith.constant 0 : index
    %385 = vector.load %arg15[%c0_148, %c0_149] : memref<1x32xf32, #tpu.memory_space<vmem>>, vector<1x32xf32>
    %c0_150 = arith.constant 0 : index
    %c0_151 = arith.constant 0 : index
    %386 = vector.load %arg16[%c0_150, %c0_151] : memref<1x32xf32, #tpu.memory_space<vmem>>, vector<1x32xf32>
    %cst_152 = arith.constant dense<0.000000e+00> : vector<1xf32>
    %387 = vector.multi_reduction <add>, %384, %cst_152 [1] : vector<1x32xf32> to vector<1xf32>
    %388 = vector.shape_cast %387 : vector<1xf32> to vector<1x1xf32>
    %cst_153 = arith.constant 3.200000e+01 : f32
    %389 = vector.broadcast %cst_153 : f32 to vector<1x1xf32>
    %390 = arith.divf %388, %389 : vector<1x1xf32>
    %391 = vector.broadcast %390 : vector<1x1xf32> to vector<1x32xf32>
    %392 = arith.subf %384, %391 : vector<1x32xf32>
    %393 = arith.mulf %392, %392 : vector<1x32xf32>
    %cst_154 = arith.constant dense<0.000000e+00> : vector<1xf32>
    %394 = vector.multi_reduction <add>, %393, %cst_154 [1] : vector<1x32xf32> to vector<1xf32>
    %395 = vector.shape_cast %394 : vector<1xf32> to vector<1x1xf32>
    %cst_155 = arith.constant 3.200000e+01 : f32
    %396 = vector.broadcast %cst_155 : f32 to vector<1x1xf32>
    %397 = arith.divf %395, %396 : vector<1x1xf32>
    %398 = vector.broadcast %390 : vector<1x1xf32> to vector<1x32xf32>
    %399 = arith.subf %384, %398 : vector<1x32xf32>
    %cst_156 = arith.constant 9.99999974E-6 : f32
    %400 = vector.broadcast %cst_156 : f32 to vector<1x1xf32>
    %401 = arith.addf %397, %400 : vector<1x1xf32>
    %402 = math.rsqrt %401 : vector<1x1xf32>
    %403 = vector.broadcast %402 : vector<1x1xf32> to vector<1x32xf32>
    %404 = arith.mulf %399, %403 : vector<1x32xf32>
    %405 = arith.mulf %404, %385 : vector<1x32xf32>
    %406 = arith.addf %405, %386 : vector<1x32xf32>
    %407 = arith.truncf %406 : vector<1x32xf32> to vector<1x32xbf16>
    %c0_157 = arith.constant 0 : index
    %c0_158 = arith.constant 0 : index
    %408 = vector.load %arg17[%c0_157, %c0_158] : memref<32x16xbf16, #tpu.memory_space<vmem>>, vector<32x16xbf16>
    %cst_159 = arith.constant dense<0.000000e+00> : vector<1x16xf32>
    %409 = tpu.matmul %407, %408, %cst_159 {dimension_numbers = #tpu.dot_dimension_numbers<[1], [0], [0], [1], [0, 0, 1, 1], [], []>} : vector<1x32xbf16>, vector<32x16xbf16>, vector<1x16xf32> -> vector<1x16xf32>
    %c0_160 = arith.constant 0 : index
    %c0_161 = arith.constant 0 : index
    %c0_162 = arith.constant 0 : index
    %410 = vector.load %arg18[%c0_160, %c0_161, %c0_162] : memref<1x1x16xf32, #tpu.memory_space<vmem>>, vector<1x1x16xf32>
    %411 = vector.shape_cast %410 : vector<1x1x16xf32> to vector<1x16xf32>
    %412 = vector.shape_cast %409 : vector<1x16xf32> to vector<1x1x16xf32>
    tpu.vector_store %arg18[%c0_160, %c0_161, %c0_162], %412 {strides = array<i32>} : memref<1x1x16xf32, #tpu.memory_space<vmem>>, vector<1x1x16xf32>,
    return
  }
  func.func @transform_0(%arg0: i32, %arg1: memref<2xi32, #tpu.memory_space<smem>>) -> (i32, i32, i32) {
    %c0_i32 = arith.constant 0 : i32
    %c0_i32_0 = arith.constant 0 : i32
    %c0_i32_1 = arith.constant 0 : i32
    return %arg0, %c0_i32, %c0_i32_0 : i32, i32, i32
  }
  func.func @transform_1(%arg0: i32, %arg1: memref<2xi32, #tpu.memory_space<smem>>) -> (i32, i32, i32) {
    %c0_i32 = arith.constant 0 : i32
    %c0_i32_0 = arith.constant 0 : i32
    %c0_i32_1 = arith.constant 0 : i32
    %c0_i32_2 = arith.constant 0 : i32
    return %c0_i32, %c0_i32_0, %c0_i32_1 : i32, i32, i32
  }
  func.func @transform_2(%arg0: i32, %arg1: memref<2xi32, #tpu.memory_space<smem>>) -> (i32, i32, i32) {
    %c0_i32 = arith.constant 0 : i32
    %c0_i32_0 = arith.constant 0 : i32
    %c0_i32_1 = arith.constant 0 : i32
    %c0_i32_2 = arith.constant 0 : i32
    return %c0_i32, %c0_i32_0, %c0_i32_1 : i32, i32, i32
  }
  func.func @transform_3(%arg0: i32, %arg1: memref<2xi32, #tpu.memory_space<smem>>) -> (i32, i32, i32) {
    %c0_i32 = arith.constant 0 : i32
    %c0_i32_0 = arith.constant 0 : i32
    %c0_i32_1 = arith.constant 0 : i32
    %c0_i32_2 = arith.constant 0 : i32
    return %c0_i32, %c0_i32_0, %c0_i32_1 : i32, i32, i32
  }
  func.func @transform_4(%arg0: i32, %arg1: memref<2xi32, #tpu.memory_space<smem>>) -> (i32, i32, i32) {
    %c0_i32 = arith.constant 0 : i32
    %c0_i32_0 = arith.constant 0 : i32
    %c0_i32_1 = arith.constant 0 : i32
    %c0_i32_2 = arith.constant 0 : i32
    return %c0_i32, %c0_i32_0, %c0_i32_1 : i32, i32, i32
  }
  func.func @transform_5(%arg0: i32, %arg1: memref<2xi32, #tpu.memory_space<smem>>) -> (i32, i32, i32) {
    %c0_i32 = arith.constant 0 : i32
    %c0_i32_0 = arith.constant 0 : i32
    %c0_i32_1 = arith.constant 0 : i32
    %c0_i32_2 = arith.constant 0 : i32
    return %c0_i32, %c0_i32_0, %c0_i32_1 : i32, i32, i32
  }
  func.func @transform_6(%arg0: i32, %arg1: memref<2xi32, #tpu.memory_space<smem>>) -> (i32, i32, i32) {
    %c0_i32 = arith.constant 0 : i32
    %c0_i32_0 = arith.constant 0 : i32
    %c0_i32_1 = arith.constant 0 : i32
    %c0_i32_2 = arith.constant 0 : i32
    return %c0_i32, %c0_i32_0, %c0_i32_1 : i32, i32, i32
  }
  func.func @transform_7(%arg0: i32, %arg1: memref<2xi32, #tpu.memory_space<smem>>) -> (i32, i32, i32) {
    %c0_i32 = arith.constant 0 : i32
    %c0_i32_0 = arith.constant 0 : i32
    %c0_i32_1 = arith.constant 0 : i32
    %c0_i32_2 = arith.constant 0 : i32
    return %c0_i32, %c0_i32_0, %c0_i32_1 : i32, i32, i32
  }
  func.func @transform_8(%arg0: i32, %arg1: memref<2xi32, #tpu.memory_space<smem>>) -> (i32, i32, i32) {
    %c0_i32 = arith.constant 0 : i32
    %c0_i32_0 = arith.constant 0 : i32
    %c0_i32_1 = arith.constant 0 : i32
    %c0_i32_2 = arith.constant 0 : i32
    return %c0_i32, %c0_i32_0, %c0_i32_1 : i32, i32, i32
  }
  func.func @transform_9(%arg0: i32, %arg1: memref<2xi32, #tpu.memory_space<smem>>) -> (i32, i32, i32) {
    %c0_i32 = arith.constant 0 : i32
    %c0_i32_0 = arith.constant 0 : i32
    %c0_i32_1 = arith.constant 0 : i32
    %c0_i32_2 = arith.constant 0 : i32
    return %c0_i32, %c0_i32_0, %c0_i32_1 : i32, i32, i32
  }
  func.func @transform_10(%arg0: i32, %arg1: memref<2xi32, #tpu.memory_space<smem>>) -> (i32, i32, i32) {
    %c0_i32 = arith.constant 0 : i32
    %c0_i32_0 = arith.constant 0 : i32
    %c0_i32_1 = arith.constant 0 : i32
    %c0_i32_2 = arith.constant 0 : i32
    return %c0_i32, %c0_i32_0, %c0_i32_1 : i32, i32, i32
  }
  func.func @transform_11(%arg0: i32, %arg1: memref<2xi32, #tpu.memory_space<smem>>) -> (i32, i32, i32) {
    %c0_i32 = arith.constant 0 : i32
    %c0_i32_0 = arith.constant 0 : i32
    %c0_i32_1 = arith.constant 0 : i32
    %c0_i32_2 = arith.constant 0 : i32
    return %c0_i32, %c0_i32_0, %c0_i32_1 : i32, i32, i32
  }
  func.func @transform_12(%arg0: i32, %arg1: memref<2xi32, #tpu.memory_space<smem>>) -> (i32, i32, i32) {
    %c0_i32 = arith.constant 0 : i32
    %c0_i32_0 = arith.constant 0 : i32
    %c0_i32_1 = arith.constant 0 : i32
    %c0_i32_2 = arith.constant 0 : i32
    return %c0_i32, %c0_i32_0, %c0_i32_1 : i32, i32, i32
  }
  func.func @transform_13(%arg0: i32, %arg1: memref<2xi32, #tpu.memory_space<smem>>) -> (i32, i32) {
    %c0_i32 = arith.constant 0 : i32
    %c0_i32_0 = arith.constant 0 : i32
    %c0_i32_1 = arith.constant 0 : i32
    return %c0_i32, %c0_i32_0 : i32, i32
  }
  func.func @transform_14(%arg0: i32, %arg1: memref<2xi32, #tpu.memory_space<smem>>) -> (i32, i32) {
    %c0_i32 = arith.constant 0 : i32
    %c0_i32_0 = arith.constant 0 : i32
    %c0_i32_1 = arith.constant 0 : i32
    return %c0_i32, %c0_i32_0 : i32, i32
  }
  func.func @transform_15(%arg0: i32, %arg1: memref<2xi32, #tpu.memory_space<smem>>) -> (i32, i32) {
    %c0_i32 = arith.constant 0 : i32
    %c0_i32_0 = arith.constant 0 : i32
    %c0_i32_1 = arith.constant 0 : i32
    return %c0_i32, %c0_i32_0 : i32, i32
  }
  func.func @transform_16(%arg0: i32, %arg1: memref<2xi32, #tpu.memory_space<smem>>) -> (i32, i32, i32) {
    %c0_i32 = arith.constant 0 : i32
    %c0_i32_0 = arith.constant 0 : i32
    %c0_i32_1 = arith.constant 0 : i32
    return %arg0, %c0_i32, %c0_i32_0 : i32, i32, i32
  }
}

</mosaic_0001>

<bundles_post_ra>
// kernel: tpu_custom_call.1
= control target key start
LH: loop header
LB: loop body
LE: loop exit
PB: predicated region body
PF: predicated region fallthrough
CT: control target
= control target key end

     0   :  { %s3609_s0 = inlined_call_operand.vmem [shape: s32[2], index: 0, kind: input, shape index: {}]   ;;  %s3610_s1 = inlined_call_operand.vmem [shape: f32[2,8,32], index: 1, kind: input, shape index: {}]   ;;  %s3611_s2 = inlined_call_operand.vmem [shape: f32[2,1,32], index: 2, kind: input, shape index: {}]   ;;  %s3612_s3 = inlined_call_operand.vmem [shape: f32[2,1,32], index: 3, kind: input, shape index: {}]   ;;  %s3613_s4 = inlined_call_operand.vmem [shape: bf16[2,32,96], index: 4, kind: input, shape index: {}]   ;;  %s3614_s5 = inlined_call_operand.vmem [shape: f32[2,1,96], index: 5, kind: input, shape index: {}]   ;;  %s3615_s6 = inlined_call_operand.vmem [shape: bf16[2,32,32], index: 6, kind: input, shape index: {}]   ;;  %s3616_s7 = inlined_call_operand.vmem [shape: f32[2,1,32], index: 7, kind: input, shape index: {}]   ;;  %s3617_s8 = inlined_call_operand.vmem [shape: f32[2,1,32], index: 8, kind: input, shape index: {}]   ;;  %s3618_s9 = inlined_call_operand.vmem [shape: f32[2,1,32], index: 9, kind: input, shape index: {}]   ;;  %s3619_s10 = inlined_call_operand.vmem [shape: bf16[2,32,128], index: 10, kind: input, shape index: {}]   ;;  %s3620_s11 = inlined_call_operand.vmem [shape: f32[2,1,128], index: 11, kind: input, shape index: {}]   ;;  %s3621_s12 = inlined_call_operand.vmem [shape: bf16[2,128,32], index: 12, kind: input, shape index: {}]   ;;  %s3622_s13 = inlined_call_operand.vmem [shape: f32[2,1,32], index: 13, kind: input, shape index: {}]   ;;  %s3623_s14 = inlined_call_operand.vmem [shape: f32[1,32], index: 14, kind: input, shape index: {}]   ;;  %s3624_s15 = inlined_call_operand.vmem [shape: f32[1,32], index: 15, kind: input, shape index: {}]   ;;  %s3625_s16 = inlined_call_operand.vmem [shape: bf16[32,16], index: 16, kind: input, shape index: {}]   ;;  %s3626_s17 = inlined_call_operand.hbm [shape: f32[2,1,16], index: 17, kind: output, shape index: {}]  }
   0x1   :  { %3642 = sst [smem:[#allocation8_spill]] %s3609_s0 }
   0x2   :  { %3643 = sst [smem:[#allocation9_spill]] %s3610_s1 }
   0x3   :  { %3644 = sst [smem:[#allocation10_spill]] %s3611_s2 }
   0x4   :  { %3645 = sst [smem:[#allocation11_spill]] %s3612_s3 }
   0x5   :  { %3646 = sst [smem:[#allocation12_spill]] %s3613_s4 }
   0x6   :  { %3647 = sst [smem:[#allocation13_spill]] %s3614_s5 }
   0x7   :  { %3648 = sst [smem:[#allocation14_spill]] %s3615_s6 }
   0x8   :  { %3649 = sst [smem:[#allocation15_spill]] %s3620_s11 }
   0x9   :  { %s3650_s26 = sld [smem:[#allocation8_spill]] }
   0xf   :  { %s22_s11 = sshll.u32 %s3650_s26, 4  ;;  %s23_s11 = int_to_ptr.vmem [resolvable:$true] %s22_s11 }
  0x10   :  { %s2916_s27 = scalar_lea.vmem %s23_s11, 16  ;;  %p2921_p1 = scmp.lt.s32.totalorder %s23_s11, %s23_s11 }
  0x11   :  { %p2917_p0 = scmp.ne.s32.totalorder %s23_s11, %s2916_s27  ;;  %p2922_p2 = scmp.lt.s32.totalorder %s2916_s27, %s2916_s27 }
  0x13   :  { %p2923_p3 = por %p2922_p2, %p2921_p1 }
  0x15   :  { %p2924_p4 = pnand %p2923_p3, %p2917_p0 }
  0x17   :  { %2927 = shalt.err (!%p2924_p4)  }
  0x18   :  { %s2992_s28 = smov [#allocation3]  }
  0x19   :  { %25 = dma.vmem_to_smem %s23_s11, 16, %s2992_s28, [#allocation2] }
  0x1a   :  { %2970 = dma.done.wait [#allocation2], 16 }
  0x1b   :  { %2971 = vsyncadd [#allocation2], 4294967280 }
  0x1c   :  { %27 = sfence }
  0x1d   :  { %28 = vsyncpa [#allocation5], 0 }
  0x1e   :  { %30 = vsyncpa [#allocation5 + $0x1], 0  ;;  %s3104_s29 = smov 0   ;;  %s3106_s0 = smov 0  }
  0x1f   :  { %s3108_s30 = smov 0   ;;  %s3110_s18 = smov 0  }
  0x20 LB: > { %s3125_s11 = sadd.s32 4294967295, %s2990_s18   ;;  %s2401_s19 = sadd.s32 4294967294, %s2990_s18   ;;  %s2990_s18 = sphi %s3110_s18, %s3677_s18   ;;  %s2986_s30 = sphi %s3108_s30, %s3676_s30   ;;  %s2982_s0 = sphi %s3106_s0, %s3675_s0   ;;  %s2978_s29 = sphi %s3104_s29, %s3674_s29  }
  0x21   : > { %s3129_s1 = sadd.s32 1, %s2990_s18   ;;  %s384_s20 = sadd.s32 1, %s2986_s30 }
  0x22   : > { %s381_s21 = ssub.s32 %s2990_s18, %s3129_s1  ;;  %p394_p5 = scmp.ne.s32.totalorder %s2986_s30, %s2982_s0 }
  0x23   : > { %p382_p6 = scmp.eq.s32.totalorder %s381_s21, 0  ;;  %p395_p7 = scmp.eq.s32.totalorder %s3125_s11, 1 }
  0x24   : > { %p400_p8 = scmp.ne.s32.totalorder %s2982_s0, %s2978_s29  ;;  %p401_p9 = scmp.eq.s32.totalorder %s2401_s19, 1 }
  0x25   : > { %s3140_s22 = scalar_select %p382_p6, %s2986_s30, %s384_s20  }
  0x26   : > { %p3142_p10 = por %p395_p7, %p394_p5  ;;  %p3146_p11 = por %p401_p9, %p400_p8 }
  0x27   : > { %p2404_p12 = scmp.ge.s32.totalorder %s2990_s18, 1  ;;  %p471_p13 = scmp.lt.s32.totalorder %s2990_s18, 3 }
  0x29   : > { %p472_p0 = pnand %p2404_p12, %p471_p13 }
  0x2a   : > { %p519_p1 = scmp.lt.s32.totalorder (!%p472_p0), %s3125_s11, 1  ;;  %s3653_s19 = sld [smem:[#allocation9_spill]] (!%p472_p0) }
  0x2b   : > { %475 = sbr.rel (%p472_p0) target bundleno = 5997 (0x176d), region = 84  ;;  %s3654_s4 = sld [smem:[#allocation12_spill]] (!%p472_p0) }
  0x2c   : > { %s3655_s2 = sld [smem:[#allocation10_spill]] (!%p472_p0)  ;;  %s3636_s27 = smov (!%p472_p0), 120  }
  0x2d   : > { %s3656_s3 = sld [smem:[#allocation11_spill]] (!%p472_p0)  ;;  %s3641_s28 = smov (!%p472_p0), 96  }
  0x2e   : > { %s3657_s5 = sld [smem:[#allocation13_spill]] (!%p472_p0)  ;;  %s3635_s21 = smov (!%p472_p0), 112  }
  0x2f   : > { %s3658_s6 = sld [smem:[#allocation14_spill]] (!%p472_p0) }
  0x30   : > { %s520_s25 = scalar_select %p519_p1, %s3125_s11, 1  ;;  %vm533_vm0 = vcmask 261120   ;;  %v2993_v8 = vmov 0.0   ;;  %vm2994_vm1 = vmmov 0   ;;  %vm633_vm2 = vcmask 64512  }
  0x31   : > { %v2836_v7 = vld [vmem:[%s3654_s4 + $0x8] sm:$0xff]   ;;  %2587 = vmatprep.subr.bf16.mxu1 %v2993_v8  ;;  %2591 = vmatprep.mubr.msk.bf16.mxu1 %vm2994_vm1, %v2993_v8  ;;  %v2837_v9 = vld [vmem:[%s3654_s4] sm:$0xff]   ;;  %v524_v38 = vlaneseq  ;;  %v3002_v42 = vmov -1e+30   ;;  %vm699_vm4 = vcmask 1043456   ;;  %vm1092_vm5 = vcmask 130048  }
  0x32   : > { %s2405_s26 = sshll.u32 %s520_s25, 3  ;;  %2588 = vmatpush3.bf16.msra.mxu1 %v2836_v7  ;;  %2601 = vmatprep.subr.bf16.mxu0 %v2993_v8  ;;  %v2406_v14 = vld [vmem:[%s3655_s2] ss:$0 sm:$0xff]  ;;  %s3628_s25 = smov 72   ;;  %vm1094_vm6 = vcmask 195584   ;;  %vm2331_vm8 = vcmask 122880  }
  0x33   : > { %s522_s20 = scalar_lea.vmem %s3653_s19, %s2405_s26  ;;  %2589 = vmatprep.subr.bf16.mxu1 %v2993_v8  ;;  %2603 = vmatprep.mubr.msk.bf16.mxu0 %vm2994_vm1, %v2993_v8  ;;  %v2407_v16 = vld [vmem:[%s3656_s3] ss:$0 sm:$0xff]  ;;  %s3637_s19 = smov 88   ;;  %v3226_v39 = vshrl.u32 %v524_v38, 7  ;;  %v527_v40 = vand.u32 127, %v524_v38 }
  0x34   : > { %v3157_v0 = vld [vmem:[%s522_s20] sm:$0xff]  ;;  %s3629_s20 = smov 80   ;;  %s3630_s26 = smov 104  }
  0x35   : > { %v534_v1 = vsel %vm533_vm0, %v3157_v0, 0.0  ;;  %v2408_v20 = vld [vmem:[%s3657_s5] ss:$0 sm:$0xff]  ;;  %vm528_vm3 = vcmp.le.s32.totalorder %v527_v40, %v3226_v39 }
  0x36   : > { %535 = vadd.xlane.f32.xlu0 %v534_v1  ;;  %2590 = vmatpush3.bf16.msra.mxu1 %v2837_v9  ;;  %v3229_v43 = vsel %vm528_vm3, 0.0, %v3002_v42 }
  0x37   : > { %2595 = vmatprep.subr.bf16.mxu1 %v2993_v8 }
  0xbf   : > { %v536_v2 = vpop.xlane.xlu0 %535 }
  0xc0   : > { %v538_v3 = vmul.f32 0.03125, %v536_v2 }
  0xc2   : > { %v539_v4 = vsub.f32 %v3157_v0, %v538_v3 }
  0xc4   : > { %v540_v5 = vmul.f32 %v539_v4, %v539_v4 }
  0xc6   : > { %v541_v6 = vsel %vm533_vm0, %v540_v5, 0.0 }
  0xc7   : > { %542 = vadd.xlane.f32.xlu0 %v541_v6 }
 0x150   : > { %v543_v10 = vpop.xlane.xlu0 %542 }
 0x151   : > { %v544_v11 = vmul.f32 0.03125, %v543_v10 }
 0x153   : > { %v545_v12 = vadd.f32 1e-05, %v544_v11 }
 0x155   : > { %2866 = vrsqrt.f32 %v545_v12 }
 0x162   : > { %v2867_v13 = vpop.eup %2866 }
 0x163   : > { %v547_v15 = vmul.f32 %v2867_v13, %v539_v4 }
 0x165   : > { %v554_v17 = vmul.f32 %v2406_v14, %v547_v15 }
 0x167   : > { %v561_v18 = vadd.f32 %v2407_v16, %v554_v17 }
 0x169   : > { %v562_v19 = vpack.c.bf16 %v561_v18, %v561_v18 }
 0x16b   : > { %2592 = vmatmul.mubr.msk.bf16.vlgmr.msra.gmra.mxu1 %vm533_vm0, %v562_v19 }
 0x16c   : > { %2597 = vmatprep.mubr.msk.bf16.mxu1 %vm2994_vm1, %v2993_v8 }
 0x22b   : > { %v623_v21 = vpop.f32.mrf.mxu1 }
 0x22c   : > { %v624_v22 = vadd.f32 %v2408_v20, %v623_v21 }
 0x22d   : > { %v2593_v23 = vpop.f32.mrf.mxu1 }
 0x22e   : > { %v3189_v24 = vpack.c.bf16 %v624_v22, %v624_v22 }
 0x22f   : > { %v626_v25 = vpop.f32.mrf.mxu1 }
 0x230   : > { %743 = vrot.lane.b32.xlu0 %v3189_v24, %s3636_s27  ;;  %631 = vrot.lane.b32.xlu1 %v3189_v24, %s3641_s28  ;;  %s3660_s27 = smov 96   ;;  %s3661_s28 = smov 88  }
 0x231   : > { %v2594_v26 = vpop.f32.mrf.mxu1 }
 0x234   : > { %745 = vrot.lane.b32.xlu1 %v3189_v24, %s3637_s19  ;;  %s3639_s19 = smov 16  }
 0x238   : > { %857 = vrot.lane.b32.xlu1 %v3189_v24, %s3629_s20  ;;  %s3633_s20 = smov 56  }
 0x23c   : > { %855 = vrot.lane.b32.xlu1 %v3189_v24, %s3635_s21  ;;  %s3663_s21 = smov 112  }
 0x240   : > { %969 = vrot.lane.b32.xlu1 %v3189_v24, %s3628_s25  ;;  %s3631_s25 = smov 64  }
 0x244   : > { %967 = vrot.lane.b32.xlu1 %v3189_v24, %s3630_s26  ;;  %s3634_s26 = smov 48  }
 0x2a2   : > { %v632_v27 = vpop.permute.xlu1 %631  ;;  %v744_v32 = vpop.permute.xlu0 %743 }
 0x2a3   : > { %v638_v28 = vsel %vm633_vm2, %v632_v27, 0 }
 0x2a4   : > { %2596 = vmatpush3.bf16.xpose.msra.mxu1 %v638_v28 }
 0x2a5   : > { %2607 = vmatprep.subr.bf16.mxu1 %v2993_v8 }
 0x2a6   : > { %v746_v29 = vpop.permute.xlu1 %745 }
 0x2a7   : > { %v751_v30 = vsel %vm633_vm2, %v746_v29, 0 }
 0x2aa   : > { %v858_v31 = vpop.permute.xlu1 %857 }
 0x2ab   : > { %2598 = vmatmul.mubr.msk.bf16.vlgmr.msra.gmra.mxu1 %vm633_vm2, %v3189_v24  ;;  %v863_v34 = vsel %vm633_vm2, %v858_v31, 0 }
 0x2ac   : > { %2608 = vmatpush3.bf16.xpose.msra.mxu1 %v751_v30  ;;  %2609 = vmatprep.mubr.msk.bf16.mxu1 %vm2994_vm1, %v2993_v8 }
 0x2ad   : > { %2619 = vmatprep.subr.bf16.mxu1 %v2993_v8 }
 0x2ae   : > { %v856_v33 = vpop.permute.xlu1 %855 }
 0x2b2   : > { %v970_v35 = vpop.permute.xlu1 %969 }
 0x2b3   : > { %2610 = vmatmul.mubr.msk.bf16.vlgmr.msra.gmra.mxu1 %vm633_vm2, %v744_v32  ;;  %v975_v36 = vsel %vm633_vm2, %v970_v35, 0 }
 0x2b4   : > { %2620 = vmatpush3.bf16.xpose.msra.mxu1 %v863_v34  ;;  %2621 = vmatprep.mubr.msk.bf16.mxu1 %vm2994_vm1, %v2993_v8 }
 0x2b5   : > { %2631 = vmatprep.subr.bf16.mxu1 %v2993_v8 }
 0x2b6   : > { %v968_v37 = vpop.permute.xlu1 %967 }
 0x2bb   : > { %2622 = vmatmul.mubr.msk.bf16.vlgmr.msra.gmra.mxu1 %vm633_vm2, %v856_v33 }
 0x2bc   : > { %2632 = vmatpush3.bf16.xpose.msra.mxu1 %v975_v36  ;;  %2633 = vmatprep.mubr.msk.bf16.mxu1 %vm2994_vm1, %v2993_v8 }
 0x2bd   : > { %2643 = vmatprep.subr.bf16.mxu1 %v2993_v8 }
 0x2c3   : > { %2634 = vmatmul.mubr.msk.bf16.vlgmr.msra.gmra.mxu1 %vm633_vm2, %v968_v37 }
 0x2c4   : > { %2647 = vmatprep.mubr.msk.bf16.mxu1 %vm2994_vm1, %v2993_v8 }
 0x36b   : > { %v674_v41 = vpop.f32.mrf.mxu1 }
 0x36c   : > { %v680_v44 = vmul.f32 0.35355338, %v674_v41 }
 0x36d   : > { %v2599_v45 = vpop.f32.mrf.mxu1 }
 0x36e   : > { %v681_v46 = vadd.f32 %v680_v44, %v3229_v43 }
 0x36f   : > { %v677_v47 = vpop.f32.mrf.mxu1 }
 0x370   : > { %v682_v48 = vsel %vm633_vm2, %v681_v46, -inf }
 0x371   : > { %683 = vmax.xlane.f32.xlu1 %v682_v48  ;;  %v2600_v49 = vpop.f32.mrf.mxu1 }
 0x373   : > { %v787_v50 = vpop.f32.mrf.mxu1 }
 0x374   : > { %v793_v51 = vmul.f32 0.35355338, %v787_v50 }
 0x375   : > { %v2611_v52 = vpop.f32.mrf.mxu1 }
 0x376   : > { %v794_v53 = vadd.f32 %v793_v51, %v3229_v43 }
 0x377   : > { %v790_v54 = vpop.f32.mrf.mxu1 }
 0x378   : > { %v795_v55 = vsel %vm633_vm2, %v794_v53, -inf }
 0x379   : > { %796 = vmax.xlane.f32.xlu0 %v795_v55  ;;  %v2612_v56 = vpop.f32.mrf.mxu1 }
 0x37b   : > { %v899_v57 = vpop.f32.mrf.mxu1 }
 0x37c   : > { %v905_v58 = vmul.f32 0.35355338, %v899_v57 }
 0x37d   : > { %v2623_v59 = vpop.f32.mrf.mxu1 }
 0x37e   : > { %v906_v60 = vadd.f32 %v905_v58, %v3229_v43 }
 0x37f   : > { %v902_v61 = vpop.f32.mrf.mxu1 }
 0x380   : > { %v907_v62 = vsel %vm633_vm2, %v906_v60, -inf }
 0x381   : > { %908 = vmax.xlane.f32.xlu1 %v907_v62  ;;  %v2624_v63 = vpop.f32.mrf.mxu1 }
 0x382   : > { %v2838_v63 = vld [vmem:[%s3658_s6 + $0x8] sm:$0xff]  }
 0x383   : > { %v1011_v1 = vpop.f32.mrf.mxu1  ;;  %2644 = vmatpush3.bf16.msra.mxu1 %v2838_v63 }
 0x384   : > { %v1017_v2 = vmul.f32 0.35355338, %v1011_v1  ;;  %2645 = vmatprep.subr.bf16.mxu1 %v2993_v8  ;;  %v2839_v1 = vld [vmem:[%s3658_s6] sm:$0xff]  }
 0x385   : > { %v2635_v3 = vpop.f32.mrf.mxu1 }
 0x386   : > { %v1018_v4 = vadd.f32 %v1017_v2, %v3229_v43 }
 0x387   : > { %v1014_v5 = vpop.f32.mrf.mxu1  ;;  %2646 = vmatpush3.bf16.msra.mxu1 %v2839_v1 }
 0x388   : > { %v1019_v6 = vsel %vm633_vm2, %v1018_v4, -inf  ;;  %2659 = vmatprep.subr.bf16.mxu1 %v2993_v8 }
 0x389   : > { %1020 = vmax.xlane.f32.xlu0 %v1019_v6  ;;  %v2636_v7 = vpop.f32.mrf.mxu1 }
 0x3fa   : > { %v684_v9 = vpop.xlane.xlu1 %683 }
 0x3fb   : > { %v685_v10 = vsub.f32 %v681_v46, %v684_v9 }
 0x3fd   : > { %v686_v11 = vmul.f32 1.442695, %v685_v10 }
 0x3ff   : > { %2868 = vpow2.f32 %v686_v11 }
 0x402   : > { %v797_v12 = vpop.xlane.xlu0 %796 }
 0x403   : > { %v798_v13 = vsub.f32 %v794_v53, %v797_v12 }
 0x405   : > { %v799_v14 = vmul.f32 1.442695, %v798_v13 }
 0x407   : > { %2870 = vpow2.f32 %v799_v14 }
 0x40a   : > { %v909_v25 = vpop.xlane.xlu1 %908 }
 0x40b   : > { %v910_v26 = vsub.f32 %v906_v60, %v909_v25 }
 0x40c   : > { %v2869_v15 = vpop.eup %2868 }
 0x40d   : > { %v688_v16 = vsel %vm633_vm2, %v2869_v15, 0.0  ;;  %v911_v27 = vmul.f32 1.442695, %v910_v26 }
 0x40e   : > { %689 = vadd.xlane.f32.xlu1 %v688_v16 }
 0x412   : > { %v1021_v17 = vpop.xlane.xlu0 %1020 }
 0x413   : > { %v1022_v18 = vsub.f32 %v1018_v4, %v1021_v17 }
 0x414   : > { %v2871_v19 = vpop.eup %2870 }
 0x415   : > { %v1023_v20 = vmul.f32 1.442695, %v1022_v18  ;;  %v801_v21 = vsel %vm633_vm2, %v2871_v19, 0.0 }
 0x416   : > { %802 = vadd.xlane.f32.xlu0 %v801_v21 }
 0x417   : > { %2872 = vpow2.f32 %v1023_v20 }
 0x418   : > { %2874 = vpow2.f32 %v911_v27 }
 0x41f   : > { %694 = vrot.lane.b32.xlu1 %v3189_v24, %s3631_s25  ;;  %s3632_s25 = smov 40  }
 0x424   : > { %v2873_v22 = vpop.eup %2872 }
 0x425   : > { %v1025_v23 = vsel %vm633_vm2, %v2873_v22, 0.0  ;;  %v2875_v28 = vpop.eup %2874 }
 0x426   : > { %1026 = vadd.xlane.f32.xlu0 %v1025_v23  ;;  %v913_v29 = vsel %vm633_vm2, %v2875_v28, 0.0 }
 0x43c   : > { %807 = vrot.lane.b32.xlu0 %v3189_v24, %s3633_s20  ;;  %s3638_s20 = smov 24  }
 0x443   : > { %914 = vadd.xlane.f32.xlu1 %v913_v29 }
 0x454   : > { %919 = vrot.lane.b32.xlu1 %v3189_v24, %s3634_s26  ;;  %s3659_s26 = sld [smem:[#allocation15_spill]] }
 0x458   : > { %1031 = vrot.lane.b32.xlu1 %v3189_v24, %s3632_s25  ;;  %s3640_s25 = smov 8  }
 0x497   : > { %v690_v30 = vpop.xlane.xlu1 %689 }
 0x498   : > { %2876 = vrcp.f32 %v690_v30 }
 0x49b   : > { %v695_v31 = vpop.permute.xlu1 %694 }
 0x49c   : > { %v701_v32 = vsel %vm699_vm4, %v695_v31, 0 }
 0x49d   : > { %2602 = vmatpush3.bf16.msra.mxu0 %v701_v32  ;;  %v2841_v32 = vld [vmem:[%s3619_s10] sm:$0xff]  }
 0x49e   : > { %2613 = vmatprep.subr.bf16.mxu0 %v2993_v8 }
 0x49f   : > { %v803_v33 = vpop.xlane.xlu0 %802 }
 0x4a0   : > { %2878 = vrcp.f32 %v803_v33 }
 0x4a5   : > { %v2877_v34 = vpop.eup %2876 }
 0x4a6   : > { %v692_v35 = vmul.f32 %v2877_v34, %v2869_v15 }
 0x4a8   : > { %v693_v36 = vpack.c.bf16 %v692_v35, %v692_v35 }
 0x4aa   : > { %2604 = vmatmul.mubr.msk.bf16.vlgmr.msra.gmra.mxu0 %vm633_vm2, %v693_v36 }
 0x4ab   : > { %2615 = vmatprep.mubr.msk.bf16.mxu0 %vm2994_vm1, %v2993_v8 }
 0x4ad   : > { %v2879_v24 = vpop.eup %2878 }
 0x4ae   : > { %v805_v38 = vmul.f32 %v2879_v24, %v2871_v19  ;;  %v2423_v19 = vld [vmem:[%s3616_s7] ss:$0 sm:$0xff] }
 0x4af   : > { %v1027_v37 = vpop.xlane.xlu0 %1026  ;;  %v2424_v24 = vld [vmem:[%s3617_s8] ss:$0 sm:$0xff] }
 0x4b0   : > { %v806_v42 = vpack.c.bf16 %v805_v38, %v805_v38  ;;  %v2425_v38 = vld [vmem:[%s3618_s9] ss:$0 sm:$0xff] }
 0x4b3   : > { %v808_v40 = vpop.permute.xlu0 %807 }
 0x4b4   : > { %v813_v41 = vsel %vm699_vm4, %v808_v40, 0 }
 0x4b5   : > { %2614 = vmatpush3.bf16.msra.mxu0 %v813_v41 }
 0x4b6   : > { %2625 = vmatprep.subr.bf16.mxu0 %v2993_v8 }
 0x4b8   : > { %2616 = vmatmul.mubr.msk.bf16.vlgmr.msra.gmra.mxu0 %vm633_vm2, %v806_v42 }
 0x4b9   : > { %2627 = vmatprep.mubr.msk.bf16.mxu0 %vm2994_vm1, %v2993_v8 }
 0x4cc   : > { %v915_v44 = vpop.xlane.xlu1 %914 }
 0x4cd   : > { %2880 = vrcp.f32 %v915_v44  ;;  %v2842_v44 = vld [vmem:[%s3621_s12 + $0x38] sm:$0xff]  }
 0x4ce   : > { %2882 = vrcp.f32 %v1027_v37 }
 0x4d0   : > { %v920_v45 = vpop.permute.xlu1 %919 }
 0x4d1   : > { %v925_v46 = vsel %vm699_vm4, %v920_v45, 0  ;;  %v2843_v45 = vld [vmem:[%s3621_s12 + $0x30] sm:$0xff]  }
 0x4d2   : > { %2626 = vmatpush3.bf16.msra.mxu0 %v925_v46  ;;  %v2844_v46 = vld [vmem:[%s3621_s12 + $0x28] sm:$0xff]  }
 0x4d3   : > { %2637 = vmatprep.subr.bf16.mxu0 %v2993_v8 }
 0x4d4   : > { %v1032_v49 = vpop.permute.xlu1 %1031 }
 0x4d5   : > { %v1037_v52 = vsel %vm699_vm4, %v1032_v49, 0  ;;  %v2847_v49 = vld [vmem:[%s3621_s12 + $0x10] sm:$0xff]  }
 0x4da   : > { %v2881_v47 = vpop.eup %2880 }
 0x4db   : > { %v917_v48 = vmul.f32 %v2881_v47, %v2875_v28  ;;  %v2883_v51 = vpop.eup %2882  ;;  %v2845_v47 = vld [vmem:[%s3621_s12 + $0x20] sm:$0xff]  }
 0x4dc   : > { %v1029_v53 = vmul.f32 %v2883_v51, %v2873_v22  ;;  %v2849_v51 = vld [vmem:[%s3621_s12] sm:$0xff]  }
 0x4dd   : > { %v918_v50 = vpack.c.bf16 %v917_v48, %v917_v48  ;;  %v2846_v48 = vld [vmem:[%s3621_s12 + $0x18] sm:$0xff]  }
 0x4de   : > { %v1030_v54 = vpack.c.bf16 %v1029_v53, %v1029_v53 }
 0x4df   : > { %2628 = vmatmul.mubr.msk.bf16.vlgmr.msra.gmra.mxu0 %vm633_vm2, %v918_v50  ;;  %v2848_v50 = vld [vmem:[%s3621_s12 + $0x8] sm:$0xff]  }
 0x4e0   : > { %2638 = vmatpush3.bf16.msra.mxu0 %v1037_v52  ;;  %2639 = vmatprep.mubr.msk.bf16.mxu0 %vm2994_vm1, %v2993_v8  ;;  %v2426_v52 = vld [vmem:[%s3659_s26] ss:$0 sm:$0xff] }
 0x4e1   : > { %2651 = vmatprep.subr.bf16.mxu0 %v2993_v8 }
 0x4e7   : > { %2640 = vmatmul.mubr.msk.bf16.vlgmr.msra.gmra.mxu0 %vm633_vm2, %v1030_v54 }
 0x4e8   : > { %2655 = vmatprep.mubr.msk.bf16.mxu0 %vm2994_vm1, %v2993_v8 }
 0x56a   : > { %v737_v55 = vpop.f32.mrf.mxu0 }
 0x56c   : > { %v2605_v56 = vpop.f32.mrf.mxu0 }
 0x56e   : > { %v740_v57 = vpop.f32.mrf.mxu0 }
 0x570   : > { %v2606_v58 = vpop.f32.mrf.mxu0 }
 0x578   : > { %v849_v59 = vpop.f32.mrf.mxu0 }
 0x579   : > { %1080 = vrot.lane.b32.xlu0 %v849_v59, %s3640_s25  ;;  %s3665_s25 = smov 64  }
 0x57a   : > { %v2617_v60 = vpop.f32.mrf.mxu0 }
 0x57c   : > { %v852_v61 = vpop.f32.mrf.mxu0 }
 0x57e   : > { %v2618_v62 = vpop.f32.mrf.mxu0 }
 0x59f   : > { %v961_v2 = vpop.f32.mrf.mxu0 }
 0x5a0   : > { %1084 = vrot.lane.b32.xlu1 %v961_v2, %s3639_s19  ;;  %s3664_s19 = smov 104  }
 0x5a1   : > { %v2629_v3 = vpop.f32.mrf.mxu0 }
 0x5a2   : > { %v2439_v3 = vld [vmem:[%s3622_s13] ss:$0 sm:$0xff] }
 0x5a3   : > { %v964_v4 = vpop.f32.mrf.mxu0 }
 0x5a5   : > { %v2630_v5 = vpop.f32.mrf.mxu0 }
 0x5a7   : > { %v1073_v6 = vpop.f32.mrf.mxu0 }
 0x5a8   : > { %1088 = vrot.lane.b32.xlu0 %v1073_v6, %s3638_s20  ;;  %s3662_s20 = smov 120  }
 0x5a9   : > { %v2641_v7 = vpop.f32.mrf.mxu0 }
 0x5ab   : > { %v1076_v9 = vpop.f32.mrf.mxu0 }
 0x5ad   : > { %v2642_v10 = vpop.f32.mrf.mxu0 }
 0x5eb   : > { %v1081_v11 = vpop.permute.xlu0 %1080 }
 0x5ec   : > { %v1091_v13 = vsel %vm633_vm2, %v737_v55, %v1081_v11 }
 0x612   : > { %v1085_v12 = vpop.permute.xlu1 %1084 }
 0x613   : > { %v1093_v14 = vsel %vm1092_vm5, %v1091_v13, %v1085_v12 }
 0x61a   : > { %v1089_v15 = vpop.permute.xlu0 %1088 }
 0x61b   : > { %v1095_v16 = vsel %vm1094_vm6, %v1093_v14, %v1089_v15 }
 0x61c   : > { %v1096_v17 = vpack.c.bf16 %v1095_v16, %v1095_v16  ;;  %v2850_v16 = vld [vmem:[%s3654_s4 + $0x18] sm:$0xff]  }
 0x61e   : > { %2648 = vmatmul.mubr.msk.bf16.vlgmr.msra.gmra.mxu1 %vm533_vm0, %v1096_v17  ;;  %v2851_v17 = vld [vmem:[%s3654_s4 + $0x10] sm:$0xff]  }
 0x61f   : > { %2675 = vmatprep.mubr.msk.bf16.mxu1 %vm2994_vm1, %v2993_v8  ;;  %2660 = vmatpush3.bf16.msra.mxu1 %v2842_v44 }
 0x620   : > { %2661 = vmatprep.subr.bf16.mxu1 %v2993_v8 }
 0x623   : > { %2662 = vmatpush3.bf16.msra.mxu1 %v2843_v45 }
 0x624   : > { %2663 = vmatprep.subr.bf16.mxu1 %v2993_v8 }
 0x627   : > { %2664 = vmatpush3.bf16.msra.mxu1 %v2844_v46 }
 0x628   : > { %2665 = vmatprep.subr.bf16.mxu1 %v2993_v8 }
 0x62b   : > { %2666 = vmatpush3.bf16.msra.mxu1 %v2845_v47 }
 0x62c   : > { %2667 = vmatprep.subr.bf16.mxu1 %v2993_v8 }
 0x62f   : > { %2668 = vmatpush3.bf16.msra.mxu1 %v2846_v48 }
 0x630   : > { %2669 = vmatprep.subr.bf16.mxu1 %v2993_v8 }
 0x633   : > { %2670 = vmatpush3.bf16.msra.mxu1 %v2847_v49 }
 0x634   : > { %2671 = vmatprep.subr.bf16.mxu1 %v2993_v8 }
 0x637   : > { %2672 = vmatpush3.bf16.msra.mxu1 %v2848_v50 }
 0x638   : > { %2673 = vmatprep.subr.bf16.mxu1 %v2993_v8 }
 0x63b   : > { %2674 = vmatpush3.bf16.msra.mxu1 %v2849_v51 }
 0x63c   : > { %2705 = vmatprep.subr.bf16.mxu1 %v2993_v8 }
 0x6de   : > { %v1150_v18 = vpop.f32.mrf.mxu1 }
 0x6df   : > { %v1156_v20 = vadd.f32 %v1150_v18, %v3157_v0  ;;  %v2840_v0 = vld [vmem:[%s3619_s10 + $0x8] sm:$0xff]  }
 0x6e0   : > { %v2649_v21 = vpop.f32.mrf.mxu1  ;;  %2652 = vmatpush3.bf16.msra.mxu0 %v2840_v0 }
 0x6e1   : > { %v3292_v22 = vadd.f32 %v2423_v19, %v1156_v20  ;;  %2653 = vmatprep.subr.bf16.mxu0 %v2993_v8 }
 0x6e2   : > { %v1153_v23 = vpop.f32.mrf.mxu1 }
 0x6e3   : > { %v1167_v25 = vsel %vm533_vm0, %v3292_v22, 0.0 }
 0x6e4   : > { %1168 = vadd.xlane.f32.xlu1 %v1167_v25  ;;  %v2650_v26 = vpop.f32.mrf.mxu1  ;;  %2654 = vmatpush3.bf16.msra.mxu0 %v2841_v32  ;;  %v2443_v25 = vld [vmem:[%s3656_s3 + $0x1] ss:$0 sm:$0xff] }
 0x6e5   : > { %2679 = vmatprep.subr.bf16.mxu0 %v2993_v8 }
 0x76d   : > { %v1169_v27 = vpop.xlane.xlu1 %1168 }
 0x76e   : > { %v1170_v28 = vmul.f32 0.03125, %v1169_v27 }
 0x770   : > { %v1171_v29 = vsub.f32 %v3292_v22, %v1170_v28 }
 0x772   : > { %v1172_v30 = vmul.f32 %v1171_v29, %v1171_v29 }
 0x774   : > { %v1173_v31 = vsel %vm533_vm0, %v1172_v30, 0.0 }
 0x775   : > { %1174 = vadd.xlane.f32.xlu0 %v1173_v31 }
 0x7fe   : > { %v1175_v33 = vpop.xlane.xlu0 %1174 }
 0x7ff   : > { %v1176_v34 = vmul.f32 0.03125, %v1175_v33 }
 0x801   : > { %v1177_v35 = vadd.f32 1e-05, %v1176_v34 }
 0x803   : > { %2884 = vrsqrt.f32 %v1177_v35 }
 0x810   : > { %v2885_v36 = vpop.eup %2884 }
 0x811   : > { %v1179_v37 = vmul.f32 %v2885_v36, %v1171_v29  ;;  %v2449_v29 = vld [vmem:[%s3657_s5 + $0x1] ss:$0 sm:$0xff] }
 0x813   : > { %v1186_v40 = vmul.f32 %v2424_v24, %v1179_v37 }
 0x815   : > { %v1193_v41 = vadd.f32 %v2425_v38, %v1186_v40 }
 0x817   : > { %v1194_v42 = vpack.c.bf16 %v1193_v41, %v1193_v41 }
 0x819   : > { %2656 = vmatmul.mubr.msk.bf16.vlgmr.msra.gmra.mxu0 %vm533_vm0, %v1194_v42 }
 0x81a   : > { %2683 = vmatprep.mubr.msk.bf16.mxu0 %vm2994_vm1, %v2993_v8  ;;  %2680 = vmatpush3.bf16.msra.mxu0 %v2850_v16 }
 0x81b   : > { %2681 = vmatprep.subr.bf16.mxu0 %v2993_v8 }
 0x81e   : > { %2682 = vmatpush3.bf16.msra.mxu0 %v2851_v17 }
 0x81f   : > { %2687 = vmatprep.subr.bf16.mxu0 %v2993_v8 }
 0x8d9   : > { %v1255_v53 = vpop.f32.mrf.mxu0 }
 0x8da   : > { %v1256_v54 = vadd.f32 %v2426_v52, %v1255_v53 }
 0x8db   : > { %v2657_v55 = vpop.f32.mrf.mxu0 }
 0x8dc   : > { %v2430_v56 = vmul.f32 -1.702, %v1256_v54 }
 0x8dd   : > { %v1258_v57 = vpop.f32.mrf.mxu0 }
 0x8de   : > { %v1263_v58 = vmul.f32 1.442695, %v2430_v56 }
 0x8df   : > { %v2658_v59 = vpop.f32.mrf.mxu0 }
 0x8e0   : > { %2886 = vpow2.f32 %v1263_v58 }
 0x8ed   : > { %v2887_v60 = vpop.eup %2886 }
 0x8ee   : > { %v1265_v61 = vadd.f32 1.0, %v2887_v60 }
 0x8f0   : > { %2888 = vrcp.f32 %v1265_v61 }
 0x8fd   : > { %v2889_v62 = vpop.eup %2888 }
 0x8fe   : > { %v1268_v63 = vmul.f32 %v2889_v62, %v1256_v54 }
 0x900   : > { %v1269_v1 = vpack.c.bf16 %v1268_v63, %v1268_v63 }
 0x902   : > { %2676 = vmatmul.mubr.bf16.vlgmr.msra.gmra.mxu1 %v1269_v1 }
 0x903   : > { %2707 = vmatprep.mubr.msk.bf16.mxu1 %vm2994_vm1, %v2993_v8 }
 0x9c2   : > { %v1368_v2 = vpop.f32.mrf.mxu1 }
 0x9c3   : > { %v1374_v4 = vadd.f32 %v1368_v2, %v3292_v22  ;;  %v2442_v22 = vld [vmem:[%s3655_s2 + $0x1] ss:$0 sm:$0xff]  ;;  %s2513_s2 = sshll.u32 %s3125_s11, 4 }
 0x9c4   : > { %v2677_v5 = vpop.f32.mrf.mxu1 }
 0x9c5   : > { %v3356_v6 = vadd.f32 %v2439_v3, %v1374_v4 }
 0x9c6   : > { %v1371_v7 = vpop.f32.mrf.mxu1 }
 0x9c7   : > { %v1387_v9 = vsel %vm533_vm0, %v3356_v6, 0.0 }
 0x9c8   : > { %1388 = vadd.xlane.f32.xlu0 %v1387_v9  ;;  %v2678_v10 = vpop.f32.mrf.mxu1 }
 0xa51   : > { %v1389_v11 = vpop.xlane.xlu0 %1388 }
 0xa52   : > { %v1390_v12 = vmul.f32 0.03125, %v1389_v11 }
 0xa54   : > { %v1391_v13 = vsub.f32 %v3356_v6, %v1390_v12 }
 0xa56   : > { %v1392_v14 = vmul.f32 %v1391_v13, %v1391_v13 }
 0xa58   : > { %v1393_v15 = vsel %vm533_vm0, %v1392_v14, 0.0 }
 0xa59   : > { %1394 = vadd.xlane.f32.xlu1 %v1393_v15 }
 0xae2   : > { %v1395_v18 = vpop.xlane.xlu1 %1394 }
 0xae3   : > { %v1396_v19 = vmul.f32 0.03125, %v1395_v18 }
 0xae5   : > { %v1397_v20 = vadd.f32 1e-05, %v1396_v19 }
 0xae7   : > { %2890 = vrsqrt.f32 %v1397_v20 }
 0xaf4   : > { %v2891_v21 = vpop.eup %2890 }
 0xaf5   : > { %v1399_v23 = vmul.f32 %v2891_v21, %v1391_v13 }
 0xaf7   : > { %v1406_v26 = vmul.f32 %v2442_v22, %v1399_v23 }
 0xaf9   : > { %v1413_v27 = vadd.f32 %v2443_v25, %v1406_v26 }
 0xafb   : > { %v1414_v28 = vpack.c.bf16 %v1413_v27, %v1413_v27 }
 0xafd   : > { %2684 = vmatmul.mubr.msk.bf16.vlgmr.msra.gmra.mxu0 %vm533_vm0, %v1414_v28 }
 0xafe   : > { %2689 = vmatprep.mubr.msk.bf16.mxu0 %vm2994_vm1, %v2993_v8 }
 0xbbd   : > { %v1477_v30 = vpop.f32.mrf.mxu0 }
 0xbbe   : > { %v1478_v31 = vadd.f32 %v2449_v29, %v1477_v30 }
 0xbbf   : > { %v2685_v0 = vpop.f32.mrf.mxu0 }
 0xbc0   : > { %v3382_v32 = vpack.c.bf16 %v1478_v31, %v1478_v31 }
 0xbc1   : > { %v1480_v33 = vpop.f32.mrf.mxu0 }
 0xbc2   : > { %1485 = vrot.lane.b32.xlu0 %v3382_v32, %s3660_s27  ;;  %s3666_s27 = smov 80  }
 0xbc3   : > { %v2686_v34 = vpop.f32.mrf.mxu0 }
 0xbc6   : > { %1597 = vrot.lane.b32.xlu0 %v3382_v32, %s3661_s28  ;;  %s3667_s28 = smov 72  }
 0xbca   : > { %1595 = vrot.lane.b32.xlu0 %v3382_v32, %s3662_s20  ;;  %s3668_s20 = smov 48  }
 0xbce   : > { %1707 = vrot.lane.b32.xlu0 %v3382_v32, %s3663_s21  ;;  %s3669_s21 = smov 56  }
 0xbd2   : > { %1819 = vrot.lane.b32.xlu0 %v3382_v32, %s3664_s19  ;;  %s3670_s19 = smov 40  }
 0xc34   : > { %v1486_v35 = vpop.permute.xlu0 %1485 }
 0xc35   : > { %v1491_v36 = vsel %vm633_vm2, %v1486_v35, 0 }
 0xc36   : > { %2688 = vmatpush3.bf16.xpose.msra.mxu0 %v1491_v36 }
 0xc37   : > { %2693 = vmatprep.subr.bf16.mxu0 %v2993_v8 }
 0xc38   : > { %v1598_v55 = vpop.permute.xlu0 %1597 }
 0xc39   : > { %v1603_v57 = vsel %vm633_vm2, %v1598_v55, 0 }
 0xc3c   : > { %v1596_v59 = vpop.permute.xlu0 %1595 }
 0xc3d   : > { %2690 = vmatmul.mubr.msk.bf16.vlgmr.msra.gmra.mxu0 %vm633_vm2, %v3382_v32 }
 0xc3e   : > { %2695 = vmatprep.mubr.msk.bf16.mxu0 %vm2994_vm1, %v2993_v8 }
 0xc40   : > { %v1708_v62 = vpop.permute.xlu0 %1707 }
 0xc44   : > { %v1820_v1 = vpop.permute.xlu0 %1819 }
 0xcfd   : > { %v1527_v24 = vpop.f32.mrf.mxu0 }
 0xcfe   : > { %v1533_v37 = vmul.f32 0.35355338, %v1527_v24 }
 0xcff   : > { %v2691_v38 = vpop.f32.mrf.mxu0 }
 0xd00   : > { %v1534_v40 = vadd.f32 %v1533_v37, %v3229_v43 }
 0xd01   : > { %v1530_v41 = vpop.f32.mrf.mxu0 }
 0xd02   : > { %v1535_v42 = vsel %vm633_vm2, %v1534_v40, -inf }
 0xd03   : > { %1536 = vmax.xlane.f32.xlu1 %v1535_v42  ;;  %v2692_v44 = vpop.f32.mrf.mxu0 }
 0xd8c   : > { %v1537_v45 = vpop.xlane.xlu1 %1536 }
 0xd8d   : > { %v1538_v46 = vsub.f32 %v1534_v40, %v1537_v45 }
 0xd8f   : > { %v1539_v47 = vmul.f32 1.442695, %v1538_v46 }
 0xd91   : > { %2892 = vpow2.f32 %v1539_v47 }
 0xd9e   : > { %v2893_v48 = vpop.eup %2892 }
 0xd9f   : > { %v1541_v49 = vsel %vm633_vm2, %v2893_v48, 0.0 }
 0xda0   : > { %1542 = vadd.xlane.f32.xlu1 %v1541_v49 }
 0xdb1   : > { %1547 = vrot.lane.b32.xlu1 %v3382_v32, %s3665_s25  ;;  %s3673_s25 = smov 24  }
 0xdb5   : > { %1709 = vrot.lane.b32.xlu1 %v3382_v32, %s3666_s27  ;;  %s3568_s27 = scalar_lea.hbm %s3626_s17, %s2513_s2 }
 0xdb9   : > { %1821 = vrot.lane.b32.xlu1 %v3382_v32, %s3667_s28  ;;  %s3671_s28 = smov 8  }
 0xe29   : > { %v1543_v50 = vpop.xlane.xlu1 %1542 }
 0xe2a   : > { %2894 = vrcp.f32 %v1543_v50 }
 0xe2d   : > { %v1548_v51 = vpop.permute.xlu1 %1547 }
 0xe2e   : > { %v1553_v52 = vsel %vm699_vm4, %v1548_v51, 0 }
 0xe2f   : > { %2694 = vmatpush3.bf16.msra.mxu0 %v1553_v52 }
 0xe30   : > { %2699 = vmatprep.subr.bf16.mxu0 %v2993_v8 }
 0xe31   : > { %v1710_v58 = vpop.permute.xlu1 %1709 }
 0xe32   : > { %v1715_v60 = vsel %vm633_vm2, %v1710_v58, 0 }
 0xe35   : > { %v1822_v61 = vpop.permute.xlu1 %1821 }
 0xe36   : > { %v1827_v63 = vsel %vm633_vm2, %v1822_v61, 0 }
 0xe37   : > { %v2895_v53 = vpop.eup %2894 }
 0xe38   : > { %v1545_v54 = vmul.f32 %v2895_v53, %v2893_v48 }
 0xe3a   : > { %v1546_v56 = vpack.c.bf16 %v1545_v54, %v1545_v54 }
 0xe3c   : > { %2696 = vmatmul.mubr.msk.bf16.vlgmr.msra.gmra.mxu0 %vm633_vm2, %v1546_v56 }
 0xe3d   : > { %2700 = vmatpush3.bf16.xpose.msra.mxu0 %v1603_v57  ;;  %2701 = vmatprep.mubr.msk.bf16.mxu0 %vm2994_vm1, %v2993_v8 }
 0xe3e   : > { %2711 = vmatprep.subr.bf16.mxu0 %v2993_v8 }
 0xe44   : > { %2702 = vmatmul.mubr.msk.bf16.vlgmr.msra.gmra.mxu0 %vm633_vm2, %v1596_v59 }
 0xe45   : > { %2712 = vmatpush3.bf16.xpose.msra.mxu0 %v1715_v60  ;;  %2713 = vmatprep.mubr.msk.bf16.mxu0 %vm2994_vm1, %v2993_v8 }
 0xe46   : > { %2723 = vmatprep.subr.bf16.mxu0 %v2993_v8 }
 0xe4c   : > { %2714 = vmatmul.mubr.msk.bf16.vlgmr.msra.gmra.mxu0 %vm633_vm2, %v1708_v62  ;;  %v2852_v62 = vld [vmem:[%s3658_s6 + $0x18] sm:$0xff]  }
 0xe4d   : > { %2724 = vmatpush3.bf16.xpose.msra.mxu0 %v1827_v63  ;;  %2725 = vmatprep.mubr.msk.bf16.mxu0 %vm2994_vm1, %v2993_v8 }
 0xe4e   : > { %2735 = vmatprep.subr.bf16.mxu0 %v2993_v8 }
 0xe54   : > { %2726 = vmatmul.mubr.msk.bf16.vlgmr.msra.gmra.mxu0 %vm633_vm2, %v1820_v1 }
 0xe55   : > { %2739 = vmatprep.mubr.msk.bf16.mxu0 %vm2994_vm1, %v2993_v8  ;;  %2736 = vmatpush3.bf16.msra.mxu0 %v2852_v62 }
 0xe56   : > { %2737 = vmatprep.subr.bf16.mxu0 %v2993_v8 }
 0xefc   : > { %v3429_v2 = vpop.f32.mrf.mxu0 }
 0xefe   : > { %v2697_v3 = vpop.f32.mrf.mxu0 }
 0xf00   : > { %v1592_v4 = vpop.f32.mrf.mxu0 }
 0xf02   : > { %v2698_v5 = vpop.f32.mrf.mxu0 }
 0xf04   : > { %v1639_v7 = vpop.f32.mrf.mxu0 }
 0xf05   : > { %v1645_v9 = vmul.f32 0.35355338, %v1639_v7 }
 0xf06   : > { %v2703_v10 = vpop.f32.mrf.mxu0 }
 0xf07   : > { %v1646_v11 = vadd.f32 %v1645_v9, %v3229_v43 }
 0xf08   : > { %v1642_v12 = vpop.f32.mrf.mxu0 }
 0xf09   : > { %v1647_v13 = vsel %vm633_vm2, %v1646_v11, -inf }
 0xf0a   : > { %1648 = vmax.xlane.f32.xlu1 %v1647_v13  ;;  %v2704_v14 = vpop.f32.mrf.mxu0 }
 0xf0c   : > { %v1751_v15 = vpop.f32.mrf.mxu0 }
 0xf0d   : > { %v1757_v16 = vmul.f32 0.35355338, %v1751_v15 }
 0xf0e   : > { %v2715_v17 = vpop.f32.mrf.mxu0 }
 0xf0f   : > { %v1758_v18 = vadd.f32 %v1757_v16, %v3229_v43 }
 0xf10   : > { %v1754_v19 = vpop.f32.mrf.mxu0 }
 0xf11   : > { %v1759_v20 = vsel %vm633_vm2, %v1758_v18, -inf }
 0xf12   : > { %1760 = vmax.xlane.f32.xlu0 %v1759_v20  ;;  %v2716_v21 = vpop.f32.mrf.mxu0 }
 0xf14   : > { %v1863_v22 = vpop.f32.mrf.mxu0 }
 0xf15   : > { %v1869_v23 = vmul.f32 0.35355338, %v1863_v22 }
 0xf16   : > { %v2727_v25 = vpop.f32.mrf.mxu0 }
 0xf17   : > { %v1870_v26 = vadd.f32 %v1869_v23, %v3229_v43  ;;  %v2469_v25 = vld [vmem:[%s3616_s7 + $0x1] ss:$0 sm:$0xff] }
 0xf18   : > { %v1866_v27 = vpop.f32.mrf.mxu0 }
 0xf19   : > { %v1871_v28 = vsel %vm633_vm2, %v1870_v26, -inf }
 0xf1a   : > { %1872 = vmax.xlane.f32.xlu0 %v1871_v28  ;;  %v2728_v29 = vpop.f32.mrf.mxu0 }
 0xf93   : > { %v1649_v30 = vpop.xlane.xlu1 %1648 }
 0xf94   : > { %v1650_v31 = vsub.f32 %v1646_v11, %v1649_v30  ;;  %v2853_v11 = vld [vmem:[%s3658_s6 + $0x10] sm:$0xff]  }
 0xf95   : > { %2738 = vmatpush3.bf16.msra.mxu0 %v2853_v11 }
 0xf96   : > { %v1651_v0 = vmul.f32 1.442695, %v1650_v31  ;;  %2751 = vmatprep.subr.bf16.mxu0 %v2993_v8 }
 0xf98   : > { %2896 = vpow2.f32 %v1651_v0 }
 0xf9b   : > { %v1761_v33 = vpop.xlane.xlu0 %1760 }
 0xf9c   : > { %v1762_v34 = vsub.f32 %v1758_v18, %v1761_v33 }
 0xf9e   : > { %v1763_v35 = vmul.f32 1.442695, %v1762_v34 }
 0xfa0   : > { %2898 = vpow2.f32 %v1763_v35 }
 0xfa3   : > { %v1873_v38 = vpop.xlane.xlu0 %1872 }
 0xfa4   : > { %v1874_v40 = vsub.f32 %v1870_v26, %v1873_v38 }
 0xfa5   : > { %v2897_v36 = vpop.eup %2896 }
 0xfa6   : > { %v1653_v24 = vsel %vm633_vm2, %v2897_v36, 0.0  ;;  %v1875_v41 = vmul.f32 1.442695, %v1874_v40  ;;  %v2472_v40 = vld [vmem:[%s3617_s8 + $0x1] ss:$0 sm:$0xff] }
 0xfa7   : > { %1654 = vadd.xlane.f32.xlu1 %v1653_v24 }
 0xfa8   : > { %2900 = vpow2.f32 %v1875_v41 }
 0xfad   : > { %v2899_v37 = vpop.eup %2898 }
 0xfae   : > { %v1765_v43 = vsel %vm633_vm2, %v2899_v37, 0.0 }
 0xfaf   : > { %1766 = vadd.xlane.f32.xlu0 %v1765_v43 }
 0xfb5   : > { %v2901_v42 = vpop.eup %2900 }
 0xfb6   : > { %v1877_v44 = vsel %vm633_vm2, %v2901_v42, 0.0 }
 0xfb8   : > { %1771 = vrot.lane.b32.xlu1 %v3382_v32, %s3668_s20  ;;  %s3672_s20 = smov 16  }
 0xfc5   : > { %1659 = vrot.lane.b32.xlu0 %v3382_v32, %s3669_s21  ;;  %s517_s21 = sand.u32 1, %s2982_s0  }
 0xfdc   : > { %1878 = vadd.xlane.f32.xlu1 %v1877_v44 }
 0xfed   : > { %1883 = vrot.lane.b32.xlu1 %v3382_v32, %s3670_s19  ;;  %s518_s19 = scalar_lea.vmem [#allocation4], %s517_s21 }
0x1030   : > { %v1655_v45 = vpop.xlane.xlu1 %1654 }
0x1031   : > { %2902 = vrcp.f32 %v1655_v45 }
0x1034   : > { %v1772_v51 = vpop.permute.xlu1 %1771 }
0x1035   : > { %v1777_v53 = vsel %vm699_vm4, %v1772_v51, 0  ;;  %v2860_v51 = vld [vmem:[%s3621_s12 + $0x58] sm:$0xff]  }
0x1038   : > { %v1767_v46 = vpop.xlane.xlu0 %1766 }
0x1039   : > { %2904 = vrcp.f32 %v1767_v46 }
0x103c   : > { %v1660_v47 = vpop.permute.xlu0 %1659 }
0x103d   : > { %v1665_v48 = vsel %vm699_vm4, %v1660_v47, 0  ;;  %v2856_v47 = vld [vmem:[%s3621_s12 + $0x78] sm:$0xff]  }
0x103e   : > { %v2903_v49 = vpop.eup %2902  ;;  %2706 = vmatpush3.bf16.msra.mxu1 %v1665_v48  ;;  %v2857_v48 = vld [vmem:[%s3621_s12 + $0x70] sm:$0xff]  }
0x103f   : > { %2717 = vmatprep.subr.bf16.mxu1 %v2993_v8  ;;  %v1657_v50 = vmul.f32 %v2903_v49, %v2897_v36  ;;  %v2855_v36 = vld [vmem:[%s3619_s10 + $0x10] sm:$0xff]   ;;  %v2858_v49 = vld [vmem:[%s3621_s12 + $0x68] sm:$0xff]  }
0x1041   : > { %v1658_v52 = vpack.c.bf16 %v1657_v50, %v1657_v50  ;;  %v2859_v50 = vld [vmem:[%s3621_s12 + $0x60] sm:$0xff]  }
0x1043   : > { %2708 = vmatmul.mubr.msk.bf16.vlgmr.msra.gmra.mxu1 %vm633_vm2, %v1658_v52  ;;  %v2861_v52 = vld [vmem:[%s3621_s12 + $0x50] sm:$0xff]  }
0x1044   : > { %2718 = vmatpush3.bf16.msra.mxu1 %v1777_v53  ;;  %2719 = vmatprep.mubr.msk.bf16.mxu1 %vm2994_vm1, %v2993_v8  ;;  %v2862_v53 = vld [vmem:[%s3621_s12 + $0x48] sm:$0xff]  }
0x1045   : > { %2729 = vmatprep.subr.bf16.mxu1 %v2993_v8 }
0x1046   : > { %v2905_v32 = vpop.eup %2904 }
0x1047   : > { %v1769_v54 = vmul.f32 %v2905_v32, %v2899_v37  ;;  %v2863_v32 = vld [vmem:[%s3621_s12 + $0x40] sm:$0xff]  }
0x1049   : > { %v1770_v55 = vpack.c.bf16 %v1769_v54, %v1769_v54  ;;  %v2479_v54 = vld [vmem:[%s3659_s26 + $0x1] ss:$0 sm:$0xff] }
0x104b   : > { %2720 = vmatmul.mubr.msk.bf16.vlgmr.msra.gmra.mxu1 %vm633_vm2, %v1770_v55 }
0x104c   : > { %2731 = vmatprep.mubr.msk.bf16.mxu1 %vm2994_vm1, %v2993_v8 }
0x1065   : > { %v1879_v56 = vpop.xlane.xlu1 %1878 }
0x1066   : > { %2906 = vrcp.f32 %v1879_v56 }
0x1069   : > { %v1884_v57 = vpop.permute.xlu1 %1883 }
0x106a   : > { %v1889_v58 = vsel %vm699_vm4, %v1884_v57, 0 }
0x106b   : > { %2730 = vmatpush3.bf16.msra.mxu1 %v1889_v58 }
0x106c   : > { %2743 = vmatprep.subr.bf16.mxu1 %v2993_v8 }
0x1073   : > { %v2907_v59 = vpop.eup %2906 }
0x1074   : > { %v1881_v60 = vmul.f32 %v2907_v59, %v2901_v42  ;;  %v2473_v42 = vld [vmem:[%s3618_s9 + $0x1] ss:$0 sm:$0xff] }
0x1076   : > { %v1882_v61 = vpack.c.bf16 %v1881_v60, %v1881_v60 }
0x1078   : > { %2732 = vmatmul.mubr.msk.bf16.vlgmr.msra.gmra.mxu1 %vm633_vm2, %v1882_v61 }
0x1079   : > { %2747 = vmatprep.mubr.msk.bf16.mxu1 %vm2994_vm1, %v2993_v8 }
0x1103   : > { %v1701_v63 = vpop.f32.mrf.mxu1 }
0x1104   : > { %1932 = vrot.lane.b32.xlu0 %v1701_v63, %s3671_s28  ;;  %s2241_s28 = sld [smem:[#allocation3 + %s3125_s11]]  ;;  %s3010_s11 = smov [#allocation4]  }
0x1105   : > { %v2709_v1 = vpop.f32.mrf.mxu1 }
0x1107   : > { %v1704_v3 = vpop.f32.mrf.mxu1 }
0x1109   : > { %v2710_v4 = vpop.f32.mrf.mxu1 }
0x110b   : > { %v1813_v5 = vpop.f32.mrf.mxu1 }
0x110c   : > { %1936 = vrot.lane.b32.xlu1 %v1813_v5, %s3672_s20  ;;  %v2242_v5 = vstv %s2241_s28  ;;  %s2334_s28 = scalar_lea.sflag [#allocation5], %s517_s21  ;;  %s2932_s20 = sshll.u32 %s3010_s11, 4  ;;  %s2933_s20 = int_to_ptr.vmem [resolvable:$false] %s2932_s20 }
0x110d   : > { %v2721_v7 = vpop.f32.mrf.mxu1  ;;  %vm2243_vm7 = vcmp.eq.s32.totalorder %v3226_v39, %v2242_v5  ;;  %s2934_s4 = scalar_lea.vmem %s2933_s20, 32 }
0x110f   : > { %v1816_v9 = vpop.f32.mrf.mxu1 }
0x1110   : > { %v2509_v9 = vld [vmem:[%s3622_s13 + $0x1] ss:$0 sm:$0xff] }
0x1111   : > { %v2722_v10 = vpop.f32.mrf.mxu1 }
0x1138   : > { %v1925_v12 = vpop.f32.mrf.mxu1 }
0x1139   : > { %1940 = vrot.lane.b32.xlu0 %v1925_v12, %s3673_s25  ;;  %s2346_s25 = sshll.u32 %s518_s19, 4  ;;  %s3570_s25 = int_to_ptr.vmem [resolvable:$true] %s2346_s25 }
0x113a   : > { %v2733_v13 = vpop.f32.mrf.mxu1  ;;  %s2928_s3 = scalar_lea.vmem %s3570_s25, 16  ;;  %p2935_p5 = scmp.lt.s32.totalorder %s3570_s25, %s2933_s20 }
0x113b   : > { %p2929_p2 = scmp.ne.s32.totalorder %s3570_s25, %s2928_s3  ;;  %p2936_p6 = scmp.lt.s32.totalorder %s2934_s4, %s2928_s3 }
0x113c   : > { %v1928_v14 = vpop.f32.mrf.mxu1 }
0x113d   : > { %p2930_p3 = pnand %p2929_p2, %p3142_p10  ;;  %p2937_p7 = por %p2936_p6, %p2935_p5 }
0x113e   : > { %v2734_v15 = vpop.f32.mrf.mxu1 }
0x113f   : > { %p2931_p4 = pneg %p2930_p3 }
0x1141   : > { %p2938_p8 = pnand %p2937_p7, %p2931_p4 }
0x1176   : > { %v1933_v16 = vpop.permute.xlu0 %1932 }
0x1177   : > { %v1943_v18 = vsel %vm633_vm2, %v3429_v2, %v1933_v16 }
0x117e   : > { %v1937_v17 = vpop.permute.xlu1 %1936 }
0x117f   : > { %v1944_v19 = vsel %vm1092_vm5, %v1943_v18, %v1937_v17 }
0x11ab   : > { %v1941_v20 = vpop.permute.xlu0 %1940 }
0x11ac   : > { %v1945_v21 = vsel %vm1094_vm6, %v1944_v19, %v1941_v20 }
0x11ad   : > { %v1946_v22 = vpack.c.bf16 %v1945_v21, %v1945_v21 }
0x11af   : > { %2740 = vmatmul.mubr.msk.bf16.vlgmr.msra.gmra.mxu0 %vm533_vm0, %v1946_v22 }
0x11b0   : > { %2767 = vmatprep.mubr.msk.bf16.mxu0 %vm2994_vm1, %v2993_v8  ;;  %2752 = vmatpush3.bf16.msra.mxu0 %v2856_v47 }
0x11b1   : > { %2753 = vmatprep.subr.bf16.mxu0 %v2993_v8 }
0x11b4   : > { %2754 = vmatpush3.bf16.msra.mxu0 %v2857_v48 }
0x11b5   : > { %2755 = vmatprep.subr.bf16.mxu0 %v2993_v8 }
0x11b8   : > { %2756 = vmatpush3.bf16.msra.mxu0 %v2858_v49 }
0x11b9   : > { %2757 = vmatprep.subr.bf16.mxu0 %v2993_v8 }
0x11bc   : > { %2758 = vmatpush3.bf16.msra.mxu0 %v2859_v50 }
0x11bd   : > { %2759 = vmatprep.subr.bf16.mxu0 %v2993_v8 }
0x11c0   : > { %2760 = vmatpush3.bf16.msra.mxu0 %v2860_v51 }
0x11c1   : > { %2761 = vmatprep.subr.bf16.mxu0 %v2993_v8 }
0x11c4   : > { %2762 = vmatpush3.bf16.msra.mxu0 %v2861_v52 }
0x11c5   : > { %2763 = vmatprep.subr.bf16.mxu0 %v2993_v8 }
0x11c8   : > { %2764 = vmatpush3.bf16.msra.mxu0 %v2862_v53 }
0x11c9   : > { %2765 = vmatprep.subr.bf16.mxu0 %v2993_v8 }
0x11cc   : > { %2766 = vmatpush3.bf16.msra.mxu0 %v2863_v32 }
0x126f   : > { %v2001_v23 = vpop.f32.mrf.mxu0 }
0x1270   : > { %v2007_v26 = vadd.f32 %v2001_v23, %v3356_v6  ;;  %v2854_v6 = vld [vmem:[%s3619_s10 + $0x18] sm:$0xff]  }
0x1271   : > { %v2741_v27 = vpop.f32.mrf.mxu0  ;;  %2744 = vmatpush3.bf16.msra.mxu1 %v2854_v6  ;;  %v2255_v6 = vld [vmem:[%s3624_s15] sm:$0x1] }
0x1272   : > { %v3483_v2 = vadd.f32 %v2469_v25, %v2007_v26  ;;  %2745 = vmatprep.subr.bf16.mxu1 %v2993_v8 }
0x1273   : > { %v2004_v28 = vpop.f32.mrf.mxu0 }
0x1274   : > { %v2021_v29 = vsel %vm533_vm0, %v3483_v2, 0.0  ;;  %v2864_v28 = vld [vmem:[%s3625_s16 + $0x8] sm:$0xff]  }
0x1275   : > { %2022 = vadd.xlane.f32.xlu1 %v2021_v29  ;;  %v2742_v30 = vpop.f32.mrf.mxu0  ;;  %2746 = vmatpush3.bf16.msra.mxu1 %v2855_v36  ;;  %v2865_v29 = vld [vmem:[%s3625_s16] sm:$0xff]  }
0x1276   : > { %2771 = vmatprep.subr.bf16.mxu1 %v2993_v8 }
0x12fe   : > { %v2023_v31 = vpop.xlane.xlu1 %2022 }
0x12ff   : > { %v2024_v0 = vmul.f32 0.03125, %v2023_v31 }
0x1301   : > { %v2025_v33 = vsub.f32 %v3483_v2, %v2024_v0 }
0x1303   : > { %v2026_v34 = vmul.f32 %v2025_v33, %v2025_v33 }
0x1305   : > { %v2027_v35 = vsel %vm533_vm0, %v2026_v34, 0.0  ;;  %v2254_v34 = vld [vmem:[%s3623_s14] sm:$0x1] }
0x1306   : > { %2028 = vadd.xlane.f32.xlu0 %v2027_v35 }
0x138f   : > { %v2029_v24 = vpop.xlane.xlu0 %2028 }
0x1390   : > { %v2030_v37 = vmul.f32 0.03125, %v2029_v24 }
0x1392   : > { %v2031_v43 = vadd.f32 1e-05, %v2030_v37 }
0x1394   : > { %2908 = vrsqrt.f32 %v2031_v43 }
0x13a1   : > { %v2909_v38 = vpop.eup %2908 }
0x13a2   : > { %v2033_v41 = vmul.f32 %v2909_v38, %v2025_v33 }
0x13a4   : > { %v2040_v44 = vmul.f32 %v2472_v40, %v2033_v41 }
0x13a6   : > { %v2047_v45 = vadd.f32 %v2473_v42, %v2040_v44 }
0x13a8   : > { %v2048_v46 = vpack.c.bf16 %v2047_v45, %v2047_v45 }
0x13aa   : > { %2748 = vmatmul.mubr.msk.bf16.vlgmr.msra.gmra.mxu1 %vm533_vm0, %v2048_v46 }
0x13ab   : > { %2775 = vmatprep.mubr.msk.bf16.mxu1 %vm2994_vm1, %v2993_v8  ;;  %2772 = vmatpush3.bf16.msra.mxu1 %v2864_v28 }
0x13ac   : > { %2773 = vmatprep.subr.bf16.mxu1 %v2993_v8 }
0x13af   : > { %2774 = vmatpush3.bf16.msra.mxu1 %v2865_v29 }
0x146a   : > { %v2111_v55 = vpop.f32.mrf.mxu1 }
0x146b   : > { %v2112_v56 = vadd.f32 %v2479_v54, %v2111_v55 }
0x146c   : > { %v2749_v57 = vpop.f32.mrf.mxu1 }
0x146d   : > { %v2483_v58 = vmul.f32 -1.702, %v2112_v56 }
0x146e   : > { %v2114_v59 = vpop.f32.mrf.mxu1 }
0x146f   : > { %v2119_v60 = vmul.f32 1.442695, %v2483_v58 }
0x1470   : > { %v2750_v61 = vpop.f32.mrf.mxu1 }
0x1471   : > { %2910 = vpow2.f32 %v2119_v60 }
0x147e   : > { %v2911_v62 = vpop.eup %2910 }
0x147f   : > { %v2121_v63 = vadd.f32 1.0, %v2911_v62 }
0x1481   : > { %2912 = vrcp.f32 %v2121_v63 }
0x148e   : > { %v2913_v1 = vpop.eup %2912 }
0x148f   : > { %v2124_v3 = vmul.f32 %v2913_v1, %v2112_v56 }
0x1491   : > { %v2125_v4 = vpack.c.bf16 %v2124_v3, %v2124_v3 }
0x1493   : > { %2768 = vmatmul.mubr.bf16.vlgmr.msra.gmra.mxu0 %v2125_v4 }
0x1553   : > { %v2225_v7 = vpop.f32.mrf.mxu0 }
0x1554   : > { %v2231_v10 = vadd.f32 %v2225_v7, %v3483_v2 }
0x1555   : > { %v2769_v11 = vpop.f32.mrf.mxu0 }
0x1556   : > { %v2240_v12 = vadd.f32 %v2509_v9, %v2231_v10 }
0x1557   : > { %v2228_v13 = vpop.f32.mrf.mxu0 }
0x1558   : > { %v2246_v14 = vsel %vm2243_vm7, %v2240_v12, 0.0 }
0x1559   : > { %v2247_v15 = vsel %vm533_vm0, %v2246_v14, 0.0  ;;  %v2770_v16 = vpop.f32.mrf.mxu0 }
0x155a   : > { %v2248_v17 = vrot.slane %v2247_v15, 4 }
0x155c   : > { %v2249_v18 = vadd.f32 %v2248_v17, %v2247_v15 }
0x155e   : > { %v2250_v19 = vrot.slane %v2249_v18, 2 }
0x1560   : > { %v2251_v20 = vadd.f32 %v2250_v19, %v2249_v18 }
0x1562   : > { %v2252_v21 = vrot.slane %v2251_v20, 1 }
0x1564   : > { %v2253_v22 = vadd.f32 %v2252_v21, %v2251_v20 }
0x1566   : > { %v2256_v23 = vsel %vm533_vm0, %v2253_v22, 0.0 }
0x1567   : > { %2257 = vadd.xlane.f32.xlu0 %v2256_v23 }
0x15f0   : > { %v2258_v25 = vpop.xlane.xlu0 %2257 }
0x15f1   : > { %v2259_v26 = vmul.f32 0.03125, %v2258_v25 }
0x15f3   : > { %v2260_v27 = vsub.f32 %v2253_v22, %v2259_v26 }
0x15f5   : > { %v2261_v39 = vmul.f32 %v2260_v27, %v2260_v27 }
0x15f7   : > { %v2262_v2 = vsel %vm533_vm0, %v2261_v39, 0.0 }
0x15f8   : > { %2263 = vadd.xlane.f32.xlu1 %v2262_v2 }
0x1681   : > { %v2264_v30 = vpop.xlane.xlu1 %2263 }
0x1682   : > { %v2265_v31 = vmul.f32 0.03125, %v2264_v30 }
0x1684   : > { %v2266_v0 = vadd.f32 1e-05, %v2265_v31 }
0x1686   : > { %2914 = vrsqrt.f32 %v2266_v0 }
0x1693   : > { %v2915_v33 = vpop.eup %2914 }
0x1694   : > { %v2268_v35 = vmul.f32 %v2915_v33, %v2260_v27 }
0x1696   : > { %v2269_v36 = vmul.f32 %v2268_v35, %v2254_v34 }
0x1698   : > { %v2270_v24 = vadd.f32 %v2269_v36, %v2255_v6 }
0x169a   : > { %v2271_v37 = vpack.c.bf16 %v2270_v24, %v2270_v24 }
0x169c   : > { %2776 = vmatmul.mubr.msk.bf16.vlgmr.msra.gmra.mxu1 %vm533_vm0, %v2271_v37 }
0x175c   : > { %v2325_v8 = vpop.f32.mrf.mxu1 }
0x175d   : > { %2332 = vst.msk [vmem:[%s518_s19] sm:$0x1] %vm2331_vm8, %v2325_v8 }
0x175e   : > { %v2777_v43 = vpop.f32.mrf.mxu1 }
0x175f   : > { %2941 = shalt.err (!%p2938_p8)
}
0x1760   : > { %s2942_s5 = scalar_lea.hbm %s3568_s27, 16  ;;  %s2946_s19 = scalar_lea.hbm %s3626_s17, 32 }
0x1761   : > { %p2943_p9 = scmp.ne.s32.totalorder %s3568_s27, %s2942_s5  ;;  %p2947_p0 = scmp.lt.s32.totalorder %s3568_s27, %s3626_s17 }
0x1762   : > { %p2948_p1 = scmp.lt.s32.totalorder %s2946_s19, %s2942_s5 }
0x1763   : > { %p2944_p12 = pnand %p2943_p9, %p3142_p10 }
0x1764   : > { %p2949_p2 = por %p2948_p1, %p2947_p0 }
0x1765   : > { %p2945_p13 = pneg %p2944_p12 }
0x1767   : > { %p2950_p3 = pnand %p2949_p2, %p2945_p13 }
0x1769   : > { %2953 = shalt.err (!%p2950_p3)
}
0x176a   : > { %2779 = dma.vmem_to_hbm [thread:$0]  (%p3142_p10), %s3570_s25, 16, %s3568_s27, %s2334_s28   ;;  %v2328_v38 = vpop.f32.mrf.mxu1 }
0x176c   : > { %v2778_v40 = vpop.f32.mrf.mxu1 }
0x176d PF: > { %p2785_p4 = scmp.ge.s32.totalorder %s2990_s18, 2  ;;  %s2358_s3 = sand.u32 1, %s2978_s29  }
0x176e   : > { %s2359_s6 = scalar_lea.sflag [#allocation5], %s2358_s3 }
0x176f   : > { %p2782_p5 = pnand %p2785_p4, %p3146_p11 }
0x1771   : > { %p2783_p6 = pneg %p2782_p5 }
0x1773   : > { %2973 = dma.done.wait (%p2783_p6), %s2359_s6, 16  }
0x1774   : > { %2975 = vsyncadd (%p2783_p6), %s2359_s6, 4294967280  ;;  %p33_p10 = scmp.ge.s32.totalorder %s3129_s1, 4   ;;  %s3674_s29 = smov %s2982_s0 }
0x1775   : > { %s3675_s0 = smov %s2986_s30  ;;  %s3676_s30 = smov %s3140_s22 }
0x1776   : > { %s3677_s18 = smov %s3129_s1  ;;  %35 = sbr.rel (!%p33_p10) target bundleno = 32 (0x20), region = 131 }
0x177b   :  { %2363 = vsyncpa [#allocation5], 1 }
0x177c   :  { %2365 = vsyncpa [#allocation5 + $0x1], 1 }

</bundles_post_ra>
